<compile_context>
chip_gen: v6e
topology: v6e:2x2x1
jax: 0.10.0
libtpu: 0.0.40
codegen_flags: <defaults>
</compile_context>

<pallas_src>
import jax
import jax.numpy as jnp
import numpy as np
from jax.experimental import pallas as pl
from jax.experimental.pallas import tpu as pltpu

BN_EPS = 1e-5      # PyTorch nn.BatchNorm2d default
BLOCK_M = 1024     # max rows per grid step (fits VMEM with 2x buffering)

LAYER_CFG = ((0, True), (0, True), (1, False), (1, False))   # (padding, maxpool)


def _round_up(x, m):
    return ((x + m - 1) // m) * m


# -----------------------------------------------------------------------------
# Pass A: conv tile as one fused bf16 matmul (f32 acc) + BN partial statistics
# -----------------------------------------------------------------------------
def _conv_stats_kernel(cols_ref, w_ref, z_ref, stats_ref):
    # cols_ref : (T, K)    bf16 im2col rows (zero-padded rows contribute 0)
    # w_ref    : (K, C)    bf16 conv weight, k = (ky*3+kx)*Cin + ci
    # z_ref    : (T, C)    bf16 conv output tile (stats use the f32 accumulator)
    # stats_ref: (1, 2, C) f32 per-tile [sum(z); sum(z*z)]
    z = jnp.dot(cols_ref[...], w_ref[...], preferred_element_type=jnp.float32)
    z_ref[...] = z.astype(z_ref.dtype)
    s = jnp.sum(z, axis=0, keepdims=True)
    ss = jnp.sum(z * z, axis=0, keepdims=True)
    stats_ref[0] = jnp.concatenate([s, ss], axis=0)


# -----------------------------------------------------------------------------
# Pass B (pooled layers): BN affine + ReLU + 2x2 max-pool over the 4 quadrants
# -----------------------------------------------------------------------------
def _bn_relu_pool_kernel(z0_ref, z1_ref, z2_ref, z3_ref, scale_ref, shift_ref,
                         out_ref):
    s = scale_ref[...]
    b = shift_ref[...]
    r0 = jnp.maximum(z0_ref[...] * s + b, 0.0)
    r1 = jnp.maximum(z1_ref[...] * s + b, 0.0)
    r2 = jnp.maximum(z2_ref[...] * s + b, 0.0)
    r3 = jnp.maximum(z3_ref[...] * s + b, 0.0)
    res = jnp.maximum(jnp.maximum(r0, r1), jnp.maximum(r2, r3))
    out_ref[...] = res.astype(out_ref.dtype)


# -----------------------------------------------------------------------------
# Pass B (layers 3/4): BN affine + ReLU
# -----------------------------------------------------------------------------
def _bn_relu_kernel(z_ref, scale_ref, shift_ref, out_ref):
    res = jnp.maximum(z_ref[...] * scale_ref[...] + shift_ref[...], 0.0)
    out_ref[...] = res.astype(out_ref.dtype)


# -----------------------------------------------------------------------------
# One conv block: JAX glue does only layout plumbing (im2col, padding, reshape)
# -----------------------------------------------------------------------------
def _conv_bn_relu_block(x, w, gamma, beta, *, padding, pool, out_dtype):
    """x: (N, H, W, Cin) NHWC, w: (3, 3, Cin, Cout) HWIO."""
    N, H, W, Cin = x.shape
    Cout = w.shape[-1]

    xb = x.astype(jnp.bfloat16)                       # bf16 MXU operands
    if padding:
        xb = jnp.pad(xb, ((0, 0), (padding, padding), (padding, padding), (0, 0)))
    Hp, Wp = H + 2 * padding, W + 2 * padding
    Ho, Wo = Hp - 2, Wp - 2

    # im2col taps: feature index k = (ky*3 + kx)*Cin + ci
    taps = jnp.concatenate(
        [xb[:, ky:ky + Ho, kx:kx + Wo, :] for ky in range(3) for kx in range(3)],
        axis=-1)                                      # (N, Ho, Wo, 9*Cin)
    K = 9 * Cin
    count = N * Ho * Wo                               # BN population (pre-pool)

    if pool:
        # Group conv-output positions by their 2x2 pool-window offset q so the
        # pool is a max over 4 row-groups; MaxPool2d floor-drops the odd
        # remainder row/col, but those positions still feed the BN statistics.
        Hq, Wq = Ho // 2, Wo // 2
        Hoe, Woe = 2 * Hq, 2 * Wq
        Mp = N * Hq * Wq
        T = min(BLOCK_M, _round_up(Mp, 16))
        Mp_pad = _round_up(Mp, T)
        quad = taps[:, :Hoe, :Woe, :].reshape(N, Hq, 2, Wq, 2, K)
        quad = quad.transpose(2, 4, 0, 1, 3, 5).reshape(4, Mp, K)
        quad = jnp.pad(quad, ((0, 0), (0, Mp_pad - Mp), (0, 0)))
        cols = quad.reshape(4 * Mp_pad, K)
        rem_parts = []
        if Ho > Hoe:
            rem_parts.append(taps[:, Hoe:, :, :].reshape(N * (Ho - Hoe) * Wo, K))
        if Wo > Woe:
            rem_parts.append(taps[:, :Hoe, Woe:, :].reshape(N * Hoe * (Wo - Woe), K))
        if rem_parts:
            rem = jnp.concatenate(rem_parts, axis=0)
            rem = jnp.pad(rem, ((0, _round_up(rem.shape[0], T) - rem.shape[0]),
                                (0, 0)))
            cols = jnp.concatenate([cols, rem], axis=0)
    else:
        M = N * Ho * Wo
        T = min(BLOCK_M, _round_up(M, 16))
        M_pad = _round_up(M, T)
        cols = jnp.pad(taps.reshape(M, K), ((0, M_pad - M), (0, 0)))

    Mtot = cols.shape[0]
    grid_a = Mtot // T
    w2 = w.reshape(K, Cout).astype(jnp.bfloat16)
    # NOTE: Conv2d bias is mathematically dead under training-mode BatchNorm
    # (mean subtraction cancels it exactly) -> not loaded, not added.

    cparams = pltpu.CompilerParams(dimension_semantics=("parallel",),
                                   vmem_limit_bytes=32 * 1024 * 1024)

    z, partial = pl.pallas_call(
        _conv_stats_kernel,
        grid=(grid_a,),
        in_specs=[pl.BlockSpec((T, K), lambda i: (i, 0)),
                  pl.BlockSpec((K, Cout), lambda i: (0, 0))],
        out_specs=(pl.BlockSpec((T, Cout), lambda i: (i, 0)),
                   pl.BlockSpec((1, 2, Cout), lambda i: (i, 0, 0))),
        out_shape=(jax.ShapeDtypeStruct((Mtot, Cout), jnp.bfloat16),
                   jax.ShapeDtypeStruct((grid_a, 2, Cout), jnp.float32)),
        compiler_params=cparams,
        cost_estimate=pl.CostEstimate(
            flops=2 * Mtot * K * Cout + 2 * Mtot * Cout, transcendentals=0,
            bytes_accessed=Mtot * K * 2 + K * Cout * 2 + Mtot * Cout * 2
                           + grid_a * 2 * Cout * 4),
    )(cols, w2)

    # Tiny cross-tile (and cross-core on v7x) combine + scale/shift in f32.
    stats = jnp.sum(partial, axis=0)                  # (2, Cout)
    mean = stats[0] / count
    var = jnp.maximum(stats[1] / count - mean * mean, 0.0)
    scale = (gamma * jax.lax.rsqrt(var + BN_EPS)).reshape(1, Cout).astype(jnp.float32)
    shift = (beta - mean.reshape(1, Cout) * scale).astype(jnp.float32)

    out_bytes = jnp.dtype(out_dtype).itemsize

    if pool:
        nb = Mp_pad // T

        def _qmap(q):
            return lambda i: (q * nb + i, 0)

        out = pl.pallas_call(
            _bn_relu_pool_kernel,
            grid=(nb,),
            in_specs=[pl.BlockSpec((T, Cout), _qmap(0)),
                      pl.BlockSpec((T, Cout), _qmap(1)),
                      pl.BlockSpec((T, Cout), _qmap(2)),
                      pl.BlockSpec((T, Cout), _qmap(3)),
                      pl.BlockSpec((1, Cout), lambda i: (0, 0)),
                      pl.BlockSpec((1, Cout), lambda i: (0, 0))],
            out_specs=pl.BlockSpec((T, Cout), lambda i: (i, 0)),
            out_shape=jax.ShapeDtypeStruct((Mp_pad, Cout), out_dtype),
            compiler_params=cparams,
            cost_estimate=pl.CostEstimate(
                flops=12 * Mp_pad * Cout, transcendentals=0,
                bytes_accessed=4 * Mp_pad * Cout * 2 + Mp_pad * Cout * out_bytes),
        )(z, z, z, z, scale, shift)
        return out[:Mp].reshape(N, Hq, Wq, Cout)

    nb = M_pad // T
    out = pl.pallas_call(
        _bn_relu_kernel,
        grid=(nb,),
        in_specs=[pl.BlockSpec((T, Cout), lambda i: (i, 0)),
                  pl.BlockSpec((1, Cout), lambda i: (0, 0)),
                  pl.BlockSpec((1, Cout), lambda i: (0, 0))],
        out_specs=pl.BlockSpec((T, Cout), lambda i: (i, 0)),
        out_shape=jax.ShapeDtypeStruct((M_pad, Cout), out_dtype),
        compiler_params=cparams,
        cost_estimate=pl.CostEstimate(
            flops=3 * M_pad * Cout, transcendentals=0,
            bytes_accessed=M_pad * Cout * 2 + M_pad * Cout * out_bytes),
    )(z, scale, shift)
    return out[:M].reshape(N, Ho, Wo, Cout)


def cnn_encoder_forward(x_nchw, params):
    """Matches CNNEncoder.forward. Input/output are NCHW."""
    x = jnp.transpose(x_nchw, (0, 2, 3, 1))           # NCHW -> NHWC
    n_layers = len(params)
    for li, ((w, _bias, gamma, beta), (padding, pool)) in enumerate(
            zip(params, LAYER_CFG)):
        # Intermediate activations feed a bf16 MXU matmul next layer anyway, so
        # emitting bf16 here is bit-identical to f32-store-then-cast; only the
        # module output stays f32.
        out_dtype = jnp.float32 if li == n_layers - 1 else jnp.bfloat16
        x = _conv_bn_relu_block(x, w, gamma, beta, padding=padding, pool=pool,
                                out_dtype=out_dtype)
    return jnp.transpose(x, (0, 3, 1, 2))             # NHWC -> NCHW


# -----------------------------------------------------------------------------
# Deterministic synthetic parameters (PyTorch-like shapes)
# -----------------------------------------------------------------------------
def init_params(key, in_ch=3, out_ch=64):
    dims = [(in_ch, out_ch), (out_ch, out_ch), (out_ch, out_ch), (out_ch, out_ch)]
    params = []
    for ci, co in dims:
        key, k1, k2 = jax.random.split(key, 3)
        bound = 1.0 / np.sqrt(9 * ci)
        w = jax.random.uniform(k1, (3, 3, ci, co), jnp.float32, -bound, bound)
        b = jax.random.uniform(k2, (co,), jnp.float32, -bound, bound)
        gamma = jnp.ones((co,), jnp.float32)
        beta = jnp.zeros((co,), jnp.float32)
        params.append((w, b, gamma, beta))
    return params


# -----------------------------------------------------------------------------
# Pure-JAX reference (includes the conv bias, which cancels under training BN)
# -----------------------------------------------------------------------------
def ref_forward(x_nchw, params):
    x = jnp.transpose(x_nchw, (0, 2, 3, 1))
    for (w, b, gamma, beta), (padding, pool) in zip(params, LAYER_CFG):
        y = jax.lax.conv_general_dilated(
            x, w, (1, 1), [(padding, padding), (padding, padding)],
            dimension_numbers=("NHWC", "HWIO", "NHWC"))
        y = y + b
        mean = jnp.mean(y, axis=(0, 1, 2))
        var = jnp.mean((y - mean) ** 2, axis=(0, 1, 2))
        y = (y - mean) * (gamma * jax.lax.rsqrt(var + BN_EPS)) + beta
        y = jnp.maximum(y, 0.0)
        if pool:
            y = jax.lax.reduce_window(y, -jnp.inf, jax.lax.max,
                                      (1, 2, 2, 1), (1, 2, 2, 1), "VALID")
        x = y
    return jnp.transpose(x, (0, 3, 1, 2))


if __name__ == "__main__":
    key = jax.random.PRNGKey(0)
    kx, kp = jax.random.split(key)

    # PyTorch-style NCHW input: (batch=2, channels=3, 16, 16)
    x = jax.random.normal(kx, (2, 3, 16, 16), jnp.float32)
    params = init_params(kp)

    out = jax.jit(cnn_encoder_forward)(x, params)
    out = jax.block_until_ready(out)

    # 16 -> conv(p0) 14 -> pool 7 -> conv(p0) 5 -> pool 2 -> conv(p1) 2 -> conv(p1) 2
    assert out.shape == (2, 64, 2, 2), out.shape

    ref = ref_forward(x, params)
    np.testing.assert_allclose(np.asarray(out), np.asarray(ref), rtol=5e-2, atol=5e-2)

    print("KERNEL_OK")
</pallas_src>

<mosaic_0001>
module attributes {stable_mosaic.version = 11 : i64} {
  func.func @_conv_stats_kernel(%arg0: i32, %arg1: memref<112x27xbf16, #tpu.memory_space<vmem>>, %arg2: memref<27x64xbf16, #tpu.memory_space<vmem>>, %arg3: memref<112x64xbf16, #tpu.memory_space<vmem>>, %arg4: memref<1x2x64xf32, #tpu.memory_space<vmem>>) attributes {dimension_semantics = [#tpu.dimension_semantics<parallel>], iteration_bounds = array<i64: 4>, scalar_prefetch = 0 : i64, scratch_operands = 0 : i64, tpu.core_type = #tpu.core_type<tc>, window_params = [{transform_indices = @transform_0, window_bounds = array<i64: 112, 27>}, {pipeline_mode = #tpu.pipeline_mode<synchronous>, transform_indices = @transform_1, window_bounds = array<i64: 27, 64>}, {transform_indices = @transform_2, window_bounds = array<i64: 112, 64>}, {transform_indices = @transform_3, window_bounds = array<i64: 1, 2, 64>}]} {
    %c0 = arith.constant 0 : index
    %c0_0 = arith.constant 0 : index
    %0 = vector.load %arg1[%c0, %c0_0] : memref<112x27xbf16, #tpu.memory_space<vmem>>, vector<112x27xbf16>
    %c0_1 = arith.constant 0 : index
    %c0_2 = arith.constant 0 : index
    %1 = vector.load %arg2[%c0_1, %c0_2] : memref<27x64xbf16, #tpu.memory_space<vmem>>, vector<27x64xbf16>
    %cst = arith.constant dense<0.000000e+00> : vector<112x64xf32>
    %2 = tpu.matmul %0, %1, %cst {dimension_numbers = #tpu.dot_dimension_numbers<[1], [0], [0], [1], [0, 0, 1, 1], [], []>} : vector<112x27xbf16>, vector<27x64xbf16>, vector<112x64xf32> -> vector<112x64xf32>
    %3 = arith.truncf %2 : vector<112x64xf32> to vector<112x64xbf16>
    %c0_3 = arith.constant 0 : index
    %c0_4 = arith.constant 0 : index
    %4 = vector.load %arg3[%c0_3, %c0_4] : memref<112x64xbf16, #tpu.memory_space<vmem>>, vector<112x64xbf16>
    tpu.vector_store %arg3[%c0_3, %c0_4], %3 {strides = array<i32>} : memref<112x64xbf16, #tpu.memory_space<vmem>>, vector<112x64xbf16>,
    %cst_5 = arith.constant dense<0.000000e+00> : vector<64xf32>
    %5 = vector.multi_reduction <add>, %2, %cst_5 [0] : vector<112x64xf32> to vector<64xf32>
    %6 = vector.shape_cast %5 : vector<64xf32> to vector<1x64xf32>
    %7 = arith.mulf %2, %2 : vector<112x64xf32>
    %cst_6 = arith.constant dense<0.000000e+00> : vector<64xf32>
    %8 = vector.multi_reduction <add>, %7, %cst_6 [0] : vector<112x64xf32> to vector<64xf32>
    %9 = vector.shape_cast %8 : vector<64xf32> to vector<1x64xf32>
    %10 = tpu.concatenate %6, %9 in 0 : vector<1x64xf32>, vector<1x64xf32> -> vector<2x64xf32>
    %c0_7 = arith.constant 0 : index
    %c0_8 = arith.constant 0 : index
    %c0_9 = arith.constant 0 : index
    %11 = vector.load %arg4[%c0_7, %c0_8, %c0_9] : memref<1x2x64xf32, #tpu.memory_space<vmem>>, vector<1x2x64xf32>
    %12 = vector.shape_cast %11 : vector<1x2x64xf32> to vector<2x64xf32>
    %13 = vector.shape_cast %10 : vector<2x64xf32> to vector<1x2x64xf32>
    tpu.vector_store %arg4[%c0_7, %c0_8, %c0_9], %13 {strides = array<i32>} : memref<1x2x64xf32, #tpu.memory_space<vmem>>, vector<1x2x64xf32>,
    return
  }
  func.func @transform_0(%arg0: i32) -> (i32, i32) {
    %c0_i32 = arith.constant 0 : i32
    %c0_i32_0 = arith.constant 0 : i32
    return %arg0, %c0_i32 : i32, i32
  }
  func.func @transform_1(%arg0: i32) -> (i32, i32) {
    %c0_i32 = arith.constant 0 : i32
    %c0_i32_0 = arith.constant 0 : i32
    %c0_i32_1 = arith.constant 0 : i32
    return %c0_i32, %c0_i32_0 : i32, i32
  }
  func.func @transform_2(%arg0: i32) -> (i32, i32) {
    %c0_i32 = arith.constant 0 : i32
    %c0_i32_0 = arith.constant 0 : i32
    return %arg0, %c0_i32 : i32, i32
  }
  func.func @transform_3(%arg0: i32) -> (i32, i32, i32) {
    %c0_i32 = arith.constant 0 : i32
    %c0_i32_0 = arith.constant 0 : i32
    %c0_i32_1 = arith.constant 0 : i32
    return %arg0, %c0_i32, %c0_i32_0 : i32, i32, i32
  }
}

module attributes {stable_mosaic.version = 11 : i64} {
  func.func @_bn_relu_pool_kernel(%arg0: i32, %arg1: memref<112x64xbf16, #tpu.memory_space<vmem>>, %arg2: memref<112x64xbf16, #tpu.memory_space<vmem>>, %arg3: memref<112x64xbf16, #tpu.memory_space<vmem>>, %arg4: memref<112x64xbf16, #tpu.memory_space<vmem>>, %arg5: memref<1x64xf32, #tpu.memory_space<vmem>>, %arg6: memref<1x64xf32, #tpu.memory_space<vmem>>, %arg7: memref<112x64xbf16, #tpu.memory_space<vmem>>) attributes {dimension_semantics = [#tpu.dimension_semantics<parallel>], iteration_bounds = array<i64: 1>, scalar_prefetch = 0 : i64, scratch_operands = 0 : i64, tpu.core_type = #tpu.core_type<tc>, window_params = [{transform_indices = @transform_0, window_bounds = array<i64: 112, 64>}, {transform_indices = @transform_1, window_bounds = array<i64: 112, 64>}, {transform_indices = @transform_2, window_bounds = array<i64: 112, 64>}, {transform_indices = @transform_3, window_bounds = array<i64: 112, 64>}, {pipeline_mode = #tpu.pipeline_mode<synchronous>, transform_indices = @transform_4, window_bounds = array<i64: 1, 64>}, {pipeline_mode = #tpu.pipeline_mode<synchronous>, transform_indices = @transform_5, window_bounds = array<i64: 1, 64>}, {transform_indices = @transform_6, window_bounds = array<i64: 112, 64>}]} {
    %c0 = arith.constant 0 : index
    %c0_0 = arith.constant 0 : index
    %0 = vector.load %arg5[%c0, %c0_0] : memref<1x64xf32, #tpu.memory_space<vmem>>, vector<1x64xf32>
    %c0_1 = arith.constant 0 : index
    %c0_2 = arith.constant 0 : index
    %1 = vector.load %arg6[%c0_1, %c0_2] : memref<1x64xf32, #tpu.memory_space<vmem>>, vector<1x64xf32>
    %c0_3 = arith.constant 0 : index
    %c0_4 = arith.constant 0 : index
    %2 = vector.load %arg1[%c0_3, %c0_4] : memref<112x64xbf16, #tpu.memory_space<vmem>>, vector<112x64xbf16>
    %3 = arith.extf %2 : vector<112x64xbf16> to vector<112x64xf32>
    %4 = vector.broadcast %0 : vector<1x64xf32> to vector<112x64xf32>
    %5 = arith.mulf %3, %4 : vector<112x64xf32>
    %6 = vector.broadcast %1 : vector<1x64xf32> to vector<112x64xf32>
    %7 = arith.addf %5, %6 : vector<112x64xf32>
    %cst = arith.constant 0.000000e+00 : f32
    %8 = vector.broadcast %cst : f32 to vector<112x64xf32>
    %9 = arith.maximumf %7, %8 : vector<112x64xf32>
    %c0_5 = arith.constant 0 : index
    %c0_6 = arith.constant 0 : index
    %10 = vector.load %arg2[%c0_5, %c0_6] : memref<112x64xbf16, #tpu.memory_space<vmem>>, vector<112x64xbf16>
    %11 = arith.extf %10 : vector<112x64xbf16> to vector<112x64xf32>
    %12 = vector.broadcast %0 : vector<1x64xf32> to vector<112x64xf32>
    %13 = arith.mulf %11, %12 : vector<112x64xf32>
    %14 = vector.broadcast %1 : vector<1x64xf32> to vector<112x64xf32>
    %15 = arith.addf %13, %14 : vector<112x64xf32>
    %cst_7 = arith.constant 0.000000e+00 : f32
    %16 = vector.broadcast %cst_7 : f32 to vector<112x64xf32>
    %17 = arith.maximumf %15, %16 : vector<112x64xf32>
    %c0_8 = arith.constant 0 : index
    %c0_9 = arith.constant 0 : index
    %18 = vector.load %arg3[%c0_8, %c0_9] : memref<112x64xbf16, #tpu.memory_space<vmem>>, vector<112x64xbf16>
    %19 = arith.extf %18 : vector<112x64xbf16> to vector<112x64xf32>
    %20 = vector.broadcast %0 : vector<1x64xf32> to vector<112x64xf32>
    %21 = arith.mulf %19, %20 : vector<112x64xf32>
    %22 = vector.broadcast %1 : vector<1x64xf32> to vector<112x64xf32>
    %23 = arith.addf %21, %22 : vector<112x64xf32>
    %cst_10 = arith.constant 0.000000e+00 : f32
    %24 = vector.broadcast %cst_10 : f32 to vector<112x64xf32>
    %25 = arith.maximumf %23, %24 : vector<112x64xf32>
    %c0_11 = arith.constant 0 : index
    %c0_12 = arith.constant 0 : index
    %26 = vector.load %arg4[%c0_11, %c0_12] : memref<112x64xbf16, #tpu.memory_space<vmem>>, vector<112x64xbf16>
    %27 = arith.extf %26 : vector<112x64xbf16> to vector<112x64xf32>
    %28 = vector.broadcast %0 : vector<1x64xf32> to vector<112x64xf32>
    %29 = arith.mulf %27, %28 : vector<112x64xf32>
    %30 = vector.broadcast %1 : vector<1x64xf32> to vector<112x64xf32>
    %31 = arith.addf %29, %30 : vector<112x64xf32>
    %cst_13 = arith.constant 0.000000e+00 : f32
    %32 = vector.broadcast %cst_13 : f32 to vector<112x64xf32>
    %33 = arith.maximumf %31, %32 : vector<112x64xf32>
    %34 = arith.maximumf %9, %17 : vector<112x64xf32>
    %35 = arith.maximumf %25, %33 : vector<112x64xf32>
    %36 = arith.maximumf %34, %35 : vector<112x64xf32>
    %37 = arith.truncf %36 : vector<112x64xf32> to vector<112x64xbf16>
    %c0_14 = arith.constant 0 : index
    %c0_15 = arith.constant 0 : index
    %38 = vector.load %arg7[%c0_14, %c0_15] : memref<112x64xbf16, #tpu.memory_space<vmem>>, vector<112x64xbf16>
    tpu.vector_store %arg7[%c0_14, %c0_15], %37 {strides = array<i32>} : memref<112x64xbf16, #tpu.memory_space<vmem>>, vector<112x64xbf16>,
    return
  }
  func.func @transform_0(%arg0: i32) -> (i32, i32) {
    %c0_i32 = arith.constant 0 : i32
    %0 = arith.addi %c0_i32, %arg0 : i32
    %c0_i32_0 = arith.constant 0 : i32
    %c0_i32_1 = arith.constant 0 : i32
    return %0, %c0_i32_0 : i32, i32
  }
  func.func @transform_1(%arg0: i32) -> (i32, i32) {
    %c1_i32 = arith.constant 1 : i32
    %0 = arith.addi %c1_i32, %arg0 : i32
    %c0_i32 = arith.constant 0 : i32
    %c0_i32_0 = arith.constant 0 : i32
    return %0, %c0_i32 : i32, i32
  }
  func.func @transform_2(%arg0: i32) -> (i32, i32) {
    %c2_i32 = arith.constant 2 : i32
    %0 = arith.addi %c2_i32, %arg0 : i32
    %c0_i32 = arith.constant 0 : i32
    %c0_i32_0 = arith.constant 0 : i32
    return %0, %c0_i32 : i32, i32
  }
  func.func @transform_3(%arg0: i32) -> (i32, i32) {
    %c3_i32 = arith.constant 3 : i32
    %0 = arith.addi %c3_i32, %arg0 : i32
    %c0_i32 = arith.constant 0 : i32
    %c0_i32_0 = arith.constant 0 : i32
    return %0, %c0_i32 : i32, i32
  }
  func.func @transform_4(%arg0: i32) -> (i32, i32) {
    %c0_i32 = arith.constant 0 : i32
    %c0_i32_0 = arith.constant 0 : i32
    %c0_i32_1 = arith.constant 0 : i32
    return %c0_i32, %c0_i32_0 : i32, i32
  }
  func.func @transform_5(%arg0: i32) -> (i32, i32) {
    %c0_i32 = arith.constant 0 : i32
    %c0_i32_0 = arith.constant 0 : i32
    %c0_i32_1 = arith.constant 0 : i32
    return %c0_i32, %c0_i32_0 : i32, i32
  }
  func.func @transform_6(%arg0: i32) -> (i32, i32) {
    %c0_i32 = arith.constant 0 : i32
    %c0_i32_0 = arith.constant 0 : i32
    return %arg0, %c0_i32 : i32, i32
  }
}

module attributes {stable_mosaic.version = 11 : i64} {
  func.func @_bn_relu_pool_kernel(%arg0: i32, %arg1: memref<16x64xbf16, #tpu.memory_space<vmem>>, %arg2: memref<16x64xbf16, #tpu.memory_space<vmem>>, %arg3: memref<16x64xbf16, #tpu.memory_space<vmem>>, %arg4: memref<16x64xbf16, #tpu.memory_space<vmem>>, %arg5: memref<1x64xf32, #tpu.memory_space<vmem>>, %arg6: memref<1x64xf32, #tpu.memory_space<vmem>>, %arg7: memref<16x64xbf16, #tpu.memory_space<vmem>>) attributes {dimension_semantics = [#tpu.dimension_semantics<parallel>], iteration_bounds = array<i64: 1>, scalar_prefetch = 0 : i64, scratch_operands = 0 : i64, tpu.core_type = #tpu.core_type<tc>, window_params = [{transform_indices = @transform_0, window_bounds = array<i64: 16, 64>}, {transform_indices = @transform_1, window_bounds = array<i64: 16, 64>}, {transform_indices = @transform_2, window_bounds = array<i64: 16, 64>}, {transform_indices = @transform_3, window_bounds = array<i64: 16, 64>}, {pipeline_mode = #tpu.pipeline_mode<synchronous>, transform_indices = @transform_4, window_bounds = array<i64: 1, 64>}, {pipeline_mode = #tpu.pipeline_mode<synchronous>, transform_indices = @transform_5, window_bounds = array<i64: 1, 64>}, {transform_indices = @transform_6, window_bounds = array<i64: 16, 64>}]} {
    %c0 = arith.constant 0 : index
    %c0_0 = arith.constant 0 : index
    %0 = vector.load %arg5[%c0, %c0_0] : memref<1x64xf32, #tpu.memory_space<vmem>>, vector<1x64xf32>
    %c0_1 = arith.constant 0 : index
    %c0_2 = arith.constant 0 : index
    %1 = vector.load %arg6[%c0_1, %c0_2] : memref<1x64xf32, #tpu.memory_space<vmem>>, vector<1x64xf32>
    %c0_3 = arith.constant 0 : index
    %c0_4 = arith.constant 0 : index
    %2 = vector.load %arg1[%c0_3, %c0_4] : memref<16x64xbf16, #tpu.memory_space<vmem>>, vector<16x64xbf16>
    %3 = arith.extf %2 : vector<16x64xbf16> to vector<16x64xf32>
    %4 = vector.broadcast %0 : vector<1x64xf32> to vector<16x64xf32>
    %5 = arith.mulf %3, %4 : vector<16x64xf32>
    %6 = vector.broadcast %1 : vector<1x64xf32> to vector<16x64xf32>
    %7 = arith.addf %5, %6 : vector<16x64xf32>
    %cst = arith.constant 0.000000e+00 : f32
    %8 = vector.broadcast %cst : f32 to vector<16x64xf32>
    %9 = arith.maximumf %7, %8 : vector<16x64xf32>
    %c0_5 = arith.constant 0 : index
    %c0_6 = arith.constant 0 : index
    %10 = vector.load %arg2[%c0_5, %c0_6] : memref<16x64xbf16, #tpu.memory_space<vmem>>, vector<16x64xbf16>
    %11 = arith.extf %10 : vector<16x64xbf16> to vector<16x64xf32>
    %12 = vector.broadcast %0 : vector<1x64xf32> to vector<16x64xf32>
    %13 = arith.mulf %11, %12 : vector<16x64xf32>
    %14 = vector.broadcast %1 : vector<1x64xf32> to vector<16x64xf32>
    %15 = arith.addf %13, %14 : vector<16x64xf32>
    %cst_7 = arith.constant 0.000000e+00 : f32
    %16 = vector.broadcast %cst_7 : f32 to vector<16x64xf32>
    %17 = arith.maximumf %15, %16 : vector<16x64xf32>
    %c0_8 = arith.constant 0 : index
    %c0_9 = arith.constant 0 : index
    %18 = vector.load %arg3[%c0_8, %c0_9] : memref<16x64xbf16, #tpu.memory_space<vmem>>, vector<16x64xbf16>
    %19 = arith.extf %18 : vector<16x64xbf16> to vector<16x64xf32>
    %20 = vector.broadcast %0 : vector<1x64xf32> to vector<16x64xf32>
    %21 = arith.mulf %19, %20 : vector<16x64xf32>
    %22 = vector.broadcast %1 : vector<1x64xf32> to vector<16x64xf32>
    %23 = arith.addf %21, %22 : vector<16x64xf32>
    %cst_10 = arith.constant 0.000000e+00 : f32
    %24 = vector.broadcast %cst_10 : f32 to vector<16x64xf32>
    %25 = arith.maximumf %23, %24 : vector<16x64xf32>
    %c0_11 = arith.constant 0 : index
    %c0_12 = arith.constant 0 : index
    %26 = vector.load %arg4[%c0_11, %c0_12] : memref<16x64xbf16, #tpu.memory_space<vmem>>, vector<16x64xbf16>
    %27 = arith.extf %26 : vector<16x64xbf16> to vector<16x64xf32>
    %28 = vector.broadcast %0 : vector<1x64xf32> to vector<16x64xf32>
    %29 = arith.mulf %27, %28 : vector<16x64xf32>
    %30 = vector.broadcast %1 : vector<1x64xf32> to vector<16x64xf32>
    %31 = arith.addf %29, %30 : vector<16x64xf32>
    %cst_13 = arith.constant 0.000000e+00 : f32
    %32 = vector.broadcast %cst_13 : f32 to vector<16x64xf32>
    %33 = arith.maximumf %31, %32 : vector<16x64xf32>
    %34 = arith.maximumf %9, %17 : vector<16x64xf32>
    %35 = arith.maximumf %25, %33 : vector<16x64xf32>
    %36 = arith.maximumf %34, %35 : vector<16x64xf32>
    %37 = arith.truncf %36 : vector<16x64xf32> to vector<16x64xbf16>
    %c0_14 = arith.constant 0 : index
    %c0_15 = arith.constant 0 : index
    %38 = vector.load %arg7[%c0_14, %c0_15] : memref<16x64xbf16, #tpu.memory_space<vmem>>, vector<16x64xbf16>
    tpu.vector_store %arg7[%c0_14, %c0_15], %37 {strides = array<i32>} : memref<16x64xbf16, #tpu.memory_space<vmem>>, vector<16x64xbf16>,
    return
  }
  func.func @transform_0(%arg0: i32) -> (i32, i32) {
    %c0_i32 = arith.constant 0 : i32
    %0 = arith.addi %c0_i32, %arg0 : i32
    %c0_i32_0 = arith.constant 0 : i32
    %c0_i32_1 = arith.constant 0 : i32
    return %0, %c0_i32_0 : i32, i32
  }
  func.func @transform_1(%arg0: i32) -> (i32, i32) {
    %c1_i32 = arith.constant 1 : i32
    %0 = arith.addi %c1_i32, %arg0 : i32
    %c0_i32 = arith.constant 0 : i32
    %c0_i32_0 = arith.constant 0 : i32
    return %0, %c0_i32 : i32, i32
  }
  func.func @transform_2(%arg0: i32) -> (i32, i32) {
    %c2_i32 = arith.constant 2 : i32
    %0 = arith.addi %c2_i32, %arg0 : i32
    %c0_i32 = arith.constant 0 : i32
    %c0_i32_0 = arith.constant 0 : i32
    return %0, %c0_i32 : i32, i32
  }
  func.func @transform_3(%arg0: i32) -> (i32, i32) {
    %c3_i32 = arith.constant 3 : i32
    %0 = arith.addi %c3_i32, %arg0 : i32
    %c0_i32 = arith.constant 0 : i32
    %c0_i32_0 = arith.constant 0 : i32
    return %0, %c0_i32 : i32, i32
  }
  func.func @transform_4(%arg0: i32) -> (i32, i32) {
    %c0_i32 = arith.constant 0 : i32
    %c0_i32_0 = arith.constant 0 : i32
    %c0_i32_1 = arith.constant 0 : i32
    return %c0_i32, %c0_i32_0 : i32, i32
  }
  func.func @transform_5(%arg0: i32) -> (i32, i32) {
    %c0_i32 = arith.constant 0 : i32
    %c0_i32_0 = arith.constant 0 : i32
    %c0_i32_1 = arith.constant 0 : i32
    return %c0_i32, %c0_i32_0 : i32, i32
  }
  func.func @transform_6(%arg0: i32) -> (i32, i32) {
    %c0_i32 = arith.constant 0 : i32
    %c0_i32_0 = arith.constant 0 : i32
    return %arg0, %c0_i32 : i32, i32
  }
}

module attributes {stable_mosaic.version = 11 : i64} {
  func.func @_conv_stats_kernel(%arg0: i32, %arg1: memref<16x576xbf16, #tpu.memory_space<vmem>>, %arg2: memref<576x64xbf16, #tpu.memory_space<vmem>>, %arg3: memref<16x64xbf16, #tpu.memory_space<vmem>>, %arg4: memref<1x2x64xf32, #tpu.memory_space<vmem>>) attributes {dimension_semantics = [#tpu.dimension_semantics<parallel>], iteration_bounds = array<i64: 6>, scalar_prefetch = 0 : i64, scratch_operands = 0 : i64, tpu.core_type = #tpu.core_type<tc>, window_params = [{transform_indices = @transform_0, window_bounds = array<i64: 16, 576>}, {pipeline_mode = #tpu.pipeline_mode<synchronous>, transform_indices = @transform_1, window_bounds = array<i64: 576, 64>}, {transform_indices = @transform_2, window_bounds = array<i64: 16, 64>}, {transform_indices = @transform_3, window_bounds = array<i64: 1, 2, 64>}]} {
    %c0 = arith.constant 0 : index
    %c0_0 = arith.constant 0 : index
    %0 = vector.load %arg1[%c0, %c0_0] : memref<16x576xbf16, #tpu.memory_space<vmem>>, vector<16x576xbf16>
    %c0_1 = arith.constant 0 : index
    %c0_2 = arith.constant 0 : index
    %1 = vector.load %arg2[%c0_1, %c0_2] : memref<576x64xbf16, #tpu.memory_space<vmem>>, vector<576x64xbf16>
    %cst = arith.constant dense<0.000000e+00> : vector<16x64xf32>
    %2 = tpu.matmul %0, %1, %cst {dimension_numbers = #tpu.dot_dimension_numbers<[1], [0], [0], [1], [0, 0, 1, 1], [], []>} : vector<16x576xbf16>, vector<576x64xbf16>, vector<16x64xf32> -> vector<16x64xf32>
    %3 = arith.truncf %2 : vector<16x64xf32> to vector<16x64xbf16>
    %c0_3 = arith.constant 0 : index
    %c0_4 = arith.constant 0 : index
    %4 = vector.load %arg3[%c0_3, %c0_4] : memref<16x64xbf16, #tpu.memory_space<vmem>>, vector<16x64xbf16>
    tpu.vector_store %arg3[%c0_3, %c0_4], %3 {strides = array<i32>} : memref<16x64xbf16, #tpu.memory_space<vmem>>, vector<16x64xbf16>,
    %cst_5 = arith.constant dense<0.000000e+00> : vector<64xf32>
    %5 = vector.multi_reduction <add>, %2, %cst_5 [0] : vector<16x64xf32> to vector<64xf32>
    %6 = vector.shape_cast %5 : vector<64xf32> to vector<1x64xf32>
    %7 = arith.mulf %2, %2 : vector<16x64xf32>
    %cst_6 = arith.constant dense<0.000000e+00> : vector<64xf32>
    %8 = vector.multi_reduction <add>, %7, %cst_6 [0] : vector<16x64xf32> to vector<64xf32>
    %9 = vector.shape_cast %8 : vector<64xf32> to vector<1x64xf32>
    %10 = tpu.concatenate %6, %9 in 0 : vector<1x64xf32>, vector<1x64xf32> -> vector<2x64xf32>
    %c0_7 = arith.constant 0 : index
    %c0_8 = arith.constant 0 : index
    %c0_9 = arith.constant 0 : index
    %11 = vector.load %arg4[%c0_7, %c0_8, %c0_9] : memref<1x2x64xf32, #tpu.memory_space<vmem>>, vector<1x2x64xf32>
    %12 = vector.shape_cast %11 : vector<1x2x64xf32> to vector<2x64xf32>
    %13 = vector.shape_cast %10 : vector<2x64xf32> to vector<1x2x64xf32>
    tpu.vector_store %arg4[%c0_7, %c0_8, %c0_9], %13 {strides = array<i32>} : memref<1x2x64xf32, #tpu.memory_space<vmem>>, vector<1x2x64xf32>,
    return
  }
  func.func @transform_0(%arg0: i32) -> (i32, i32) {
    %c0_i32 = arith.constant 0 : i32
    %c0_i32_0 = arith.constant 0 : i32
    return %arg0, %c0_i32 : i32, i32
  }
  func.func @transform_1(%arg0: i32) -> (i32, i32) {
    %c0_i32 = arith.constant 0 : i32
    %c0_i32_0 = arith.constant 0 : i32
    %c0_i32_1 = arith.constant 0 : i32
    return %c0_i32, %c0_i32_0 : i32, i32
  }
  func.func @transform_2(%arg0: i32) -> (i32, i32) {
    %c0_i32 = arith.constant 0 : i32
    %c0_i32_0 = arith.constant 0 : i32
    return %arg0, %c0_i32 : i32, i32
  }
  func.func @transform_3(%arg0: i32) -> (i32, i32, i32) {
    %c0_i32 = arith.constant 0 : i32
    %c0_i32_0 = arith.constant 0 : i32
    %c0_i32_1 = arith.constant 0 : i32
    return %arg0, %c0_i32, %c0_i32_0 : i32, i32, i32
  }
}

module attributes {stable_mosaic.version = 11 : i64} {
  func.func @_conv_stats_kernel(%arg0: i32, %arg1: memref<16x576xbf16, #tpu.memory_space<vmem>>, %arg2: memref<576x64xbf16, #tpu.memory_space<vmem>>, %arg3: memref<16x64xbf16, #tpu.memory_space<vmem>>, %arg4: memref<1x2x64xf32, #tpu.memory_space<vmem>>) attributes {dimension_semantics = [#tpu.dimension_semantics<parallel>], iteration_bounds = array<i64: 1>, scalar_prefetch = 0 : i64, scratch_operands = 0 : i64, tpu.core_type = #tpu.core_type<tc>, window_params = [{transform_indices = @transform_0, window_bounds = array<i64: 16, 576>}, {pipeline_mode = #tpu.pipeline_mode<synchronous>, transform_indices = @transform_1, window_bounds = array<i64: 576, 64>}, {transform_indices = @transform_2, window_bounds = array<i64: 16, 64>}, {transform_indices = @transform_3, window_bounds = array<i64: 1, 2, 64>}]} {
    %c0 = arith.constant 0 : index
    %c0_0 = arith.constant 0 : index
    %0 = vector.load %arg1[%c0, %c0_0] : memref<16x576xbf16, #tpu.memory_space<vmem>>, vector<16x576xbf16>
    %c0_1 = arith.constant 0 : index
    %c0_2 = arith.constant 0 : index
    %1 = vector.load %arg2[%c0_1, %c0_2] : memref<576x64xbf16, #tpu.memory_space<vmem>>, vector<576x64xbf16>
    %cst = arith.constant dense<0.000000e+00> : vector<16x64xf32>
    %2 = tpu.matmul %0, %1, %cst {dimension_numbers = #tpu.dot_dimension_numbers<[1], [0], [0], [1], [0, 0, 1, 1], [], []>} : vector<16x576xbf16>, vector<576x64xbf16>, vector<16x64xf32> -> vector<16x64xf32>
    %3 = arith.truncf %2 : vector<16x64xf32> to vector<16x64xbf16>
    %c0_3 = arith.constant 0 : index
    %c0_4 = arith.constant 0 : index
    %4 = vector.load %arg3[%c0_3, %c0_4] : memref<16x64xbf16, #tpu.memory_space<vmem>>, vector<16x64xbf16>
    tpu.vector_store %arg3[%c0_3, %c0_4], %3 {strides = array<i32>} : memref<16x64xbf16, #tpu.memory_space<vmem>>, vector<16x64xbf16>,
    %cst_5 = arith.constant dense<0.000000e+00> : vector<64xf32>
    %5 = vector.multi_reduction <add>, %2, %cst_5 [0] : vector<16x64xf32> to vector<64xf32>
    %6 = vector.shape_cast %5 : vector<64xf32> to vector<1x64xf32>
    %7 = arith.mulf %2, %2 : vector<16x64xf32>
    %cst_6 = arith.constant dense<0.000000e+00> : vector<64xf32>
    %8 = vector.multi_reduction <add>, %7, %cst_6 [0] : vector<16x64xf32> to vector<64xf32>
    %9 = vector.shape_cast %8 : vector<64xf32> to vector<1x64xf32>
    %10 = tpu.concatenate %6, %9 in 0 : vector<1x64xf32>, vector<1x64xf32> -> vector<2x64xf32>
    %c0_7 = arith.constant 0 : index
    %c0_8 = arith.constant 0 : index
    %c0_9 = arith.constant 0 : index
    %11 = vector.load %arg4[%c0_7, %c0_8, %c0_9] : memref<1x2x64xf32, #tpu.memory_space<vmem>>, vector<1x2x64xf32>
    %12 = vector.shape_cast %11 : vector<1x2x64xf32> to vector<2x64xf32>
    %13 = vector.shape_cast %10 : vector<2x64xf32> to vector<1x2x64xf32>
    tpu.vector_store %arg4[%c0_7, %c0_8, %c0_9], %13 {strides = array<i32>} : memref<1x2x64xf32, #tpu.memory_space<vmem>>, vector<1x2x64xf32>,
    return
  }
  func.func @transform_0(%arg0: i32) -> (i32, i32) {
    %c0_i32 = arith.constant 0 : i32
    %c0_i32_0 = arith.constant 0 : i32
    return %arg0, %c0_i32 : i32, i32
  }
  func.func @transform_1(%arg0: i32) -> (i32, i32) {
    %c0_i32 = arith.constant 0 : i32
    %c0_i32_0 = arith.constant 0 : i32
    %c0_i32_1 = arith.constant 0 : i32
    return %c0_i32, %c0_i32_0 : i32, i32
  }
  func.func @transform_2(%arg0: i32) -> (i32, i32) {
    %c0_i32 = arith.constant 0 : i32
    %c0_i32_0 = arith.constant 0 : i32
    return %arg0, %c0_i32 : i32, i32
  }
  func.func @transform_3(%arg0: i32) -> (i32, i32, i32) {
    %c0_i32 = arith.constant 0 : i32
    %c0_i32_0 = arith.constant 0 : i32
    %c0_i32_1 = arith.constant 0 : i32
    return %arg0, %c0_i32, %c0_i32_0 : i32, i32, i32
  }
}

module attributes {stable_mosaic.version = 11 : i64} {
  func.func @_bn_relu_kernel(%arg0: i32, %arg1: memref<16x64xbf16, #tpu.memory_space<vmem>>, %arg2: memref<1x64xf32, #tpu.memory_space<vmem>>, %arg3: memref<1x64xf32, #tpu.memory_space<vmem>>, %arg4: memref<16x64xbf16, #tpu.memory_space<vmem>>) attributes {dimension_semantics = [#tpu.dimension_semantics<parallel>], iteration_bounds = array<i64: 1>, scalar_prefetch = 0 : i64, scratch_operands = 0 : i64, tpu.core_type = #tpu.core_type<tc>, window_params = [{transform_indices = @transform_0, window_bounds = array<i64: 16, 64>}, {pipeline_mode = #tpu.pipeline_mode<synchronous>, transform_indices = @transform_1, window_bounds = array<i64: 1, 64>}, {pipeline_mode = #tpu.pipeline_mode<synchronous>, transform_indices = @transform_2, window_bounds = array<i64: 1, 64>}, {transform_indices = @transform_3, window_bounds = array<i64: 16, 64>}]} {
    %c0 = arith.constant 0 : index
    %c0_0 = arith.constant 0 : index
    %0 = vector.load %arg1[%c0, %c0_0] : memref<16x64xbf16, #tpu.memory_space<vmem>>, vector<16x64xbf16>
    %c0_1 = arith.constant 0 : index
    %c0_2 = arith.constant 0 : index
    %1 = vector.load %arg2[%c0_1, %c0_2] : memref<1x64xf32, #tpu.memory_space<vmem>>, vector<1x64xf32>
    %2 = arith.extf %0 : vector<16x64xbf16> to vector<16x64xf32>
    %3 = vector.broadcast %1 : vector<1x64xf32> to vector<16x64xf32>
    %4 = arith.mulf %2, %3 : vector<16x64xf32>
    %c0_3 = arith.constant 0 : index
    %c0_4 = arith.constant 0 : index
    %5 = vector.load %arg3[%c0_3, %c0_4] : memref<1x64xf32, #tpu.memory_space<vmem>>, vector<1x64xf32>
    %6 = vector.broadcast %5 : vector<1x64xf32> to vector<16x64xf32>
    %7 = arith.addf %4, %6 : vector<16x64xf32>
    %cst = arith.constant 0.000000e+00 : f32
    %8 = vector.broadcast %cst : f32 to vector<16x64xf32>
    %9 = arith.maximumf %7, %8 : vector<16x64xf32>
    %10 = arith.truncf %9 : vector<16x64xf32> to vector<16x64xbf16>
    %c0_5 = arith.constant 0 : index
    %c0_6 = arith.constant 0 : index
    %11 = vector.load %arg4[%c0_5, %c0_6] : memref<16x64xbf16, #tpu.memory_space<vmem>>, vector<16x64xbf16>
    tpu.vector_store %arg4[%c0_5, %c0_6], %10 {strides = array<i32>} : memref<16x64xbf16, #tpu.memory_space<vmem>>, vector<16x64xbf16>,
    return
  }
  func.func @transform_0(%arg0: i32) -> (i32, i32) {
    %c0_i32 = arith.constant 0 : i32
    %c0_i32_0 = arith.constant 0 : i32
    return %arg0, %c0_i32 : i32, i32
  }
  func.func @transform_1(%arg0: i32) -> (i32, i32) {
    %c0_i32 = arith.constant 0 : i32
    %c0_i32_0 = arith.constant 0 : i32
    %c0_i32_1 = arith.constant 0 : i32
    return %c0_i32, %c0_i32_0 : i32, i32
  }
  func.func @transform_2(%arg0: i32) -> (i32, i32) {
    %c0_i32 = arith.constant 0 : i32
    %c0_i32_0 = arith.constant 0 : i32
    %c0_i32_1 = arith.constant 0 : i32
    return %c0_i32, %c0_i32_0 : i32, i32
  }
  func.func @transform_3(%arg0: i32) -> (i32, i32) {
    %c0_i32 = arith.constant 0 : i32
    %c0_i32_0 = arith.constant 0 : i32
    return %arg0, %c0_i32 : i32, i32
  }
}

module attributes {stable_mosaic.version = 11 : i64} {
  func.func @_bn_relu_kernel(%arg0: i32, %arg1: memref<16x64xbf16, #tpu.memory_space<vmem>>, %arg2: memref<1x64xf32, #tpu.memory_space<vmem>>, %arg3: memref<1x64xf32, #tpu.memory_space<vmem>>, %arg4: memref<16x64xf32, #tpu.memory_space<vmem>>) attributes {dimension_semantics = [#tpu.dimension_semantics<parallel>], iteration_bounds = array<i64: 1>, scalar_prefetch = 0 : i64, scratch_operands = 0 : i64, tpu.core_type = #tpu.core_type<tc>, window_params = [{transform_indices = @transform_0, window_bounds = array<i64: 16, 64>}, {pipeline_mode = #tpu.pipeline_mode<synchronous>, transform_indices = @transform_1, window_bounds = array<i64: 1, 64>}, {pipeline_mode = #tpu.pipeline_mode<synchronous>, transform_indices = @transform_2, window_bounds = array<i64: 1, 64>}, {transform_indices = @transform_3, window_bounds = array<i64: 16, 64>}]} {
    %c0 = arith.constant 0 : index
    %c0_0 = arith.constant 0 : index
    %0 = vector.load %arg1[%c0, %c0_0] : memref<16x64xbf16, #tpu.memory_space<vmem>>, vector<16x64xbf16>
    %c0_1 = arith.constant 0 : index
    %c0_2 = arith.constant 0 : index
    %1 = vector.load %arg2[%c0_1, %c0_2] : memref<1x64xf32, #tpu.memory_space<vmem>>, vector<1x64xf32>
    %2 = arith.extf %0 : vector<16x64xbf16> to vector<16x64xf32>
    %3 = vector.broadcast %1 : vector<1x64xf32> to vector<16x64xf32>
    %4 = arith.mulf %2, %3 : vector<16x64xf32>
    %c0_3 = arith.constant 0 : index
    %c0_4 = arith.constant 0 : index
    %5 = vector.load %arg3[%c0_3, %c0_4] : memref<1x64xf32, #tpu.memory_space<vmem>>, vector<1x64xf32>
    %6 = vector.broadcast %5 : vector<1x64xf32> to vector<16x64xf32>
    %7 = arith.addf %4, %6 : vector<16x64xf32>
    %cst = arith.constant 0.000000e+00 : f32
    %8 = vector.broadcast %cst : f32 to vector<16x64xf32>
    %9 = arith.maximumf %7, %8 : vector<16x64xf32>
    %c0_5 = arith.constant 0 : index
    %c0_6 = arith.constant 0 : index
    %10 = vector.load %arg4[%c0_5, %c0_6] : memref<16x64xf32, #tpu.memory_space<vmem>>, vector<16x64xf32>
    tpu.vector_store %arg4[%c0_5, %c0_6], %9 {strides = array<i32>} : memref<16x64xf32, #tpu.memory_space<vmem>>, vector<16x64xf32>,
    return
  }
  func.func @transform_0(%arg0: i32) -> (i32, i32) {
    %c0_i32 = arith.constant 0 : i32
    %c0_i32_0 = arith.constant 0 : i32
    return %arg0, %c0_i32 : i32, i32
  }
  func.func @transform_1(%arg0: i32) -> (i32, i32) {
    %c0_i32 = arith.constant 0 : i32
    %c0_i32_0 = arith.constant 0 : i32
    %c0_i32_1 = arith.constant 0 : i32
    return %c0_i32, %c0_i32_0 : i32, i32
  }
  func.func @transform_2(%arg0: i32) -> (i32, i32) {
    %c0_i32 = arith.constant 0 : i32
    %c0_i32_0 = arith.constant 0 : i32
    %c0_i32_1 = arith.constant 0 : i32
    return %c0_i32, %c0_i32_0 : i32, i32
  }
  func.func @transform_3(%arg0: i32) -> (i32, i32) {
    %c0_i32 = arith.constant 0 : i32
    %c0_i32_0 = arith.constant 0 : i32
    return %arg0, %c0_i32 : i32, i32
  }
}

</mosaic_0001>

<bundles_post_ra>
// kernel: cnn_encoder_forward.8
= control target key start
LH: loop header
LB: loop body
LE: loop exit
PB: predicated region body
PF: predicated region fallthrough
CT: control target
= control target key end

     0   :  { %s761_s12 = smov 0   ;;  %s902_s0 = inlined_call_operand.vmem [shape: bf16[448,27], index: 0, kind: input, shape index: {}]   ;;  %s903_s1 = inlined_call_operand.vmem [shape: bf16[27,64], index: 1, kind: input, shape index: {}]   ;;  %s904_s2 = inlined_call_operand.vmem [shape: bf16[448,64], index: 2, kind: output, shape index: {0}]   ;;  %s905_s3 = inlined_call_operand.vmem [shape: f32[4,2,64], index: 3, kind: output, shape index: {1}]  }
   0x1 LB: > { %s767_s13 = sadd.s32 4294967295, %s736_s12   ;;  %p615_p0 = scmp.ge.s32.totalorder %s736_s12, 1  ;;  %s736_s12 = sphi %s761_s12, %s14_s12  }
   0x2   : > { %p141_p1 = scmp.lt.s32.totalorder %s736_s12, 5 }
   0x4   : > { %p142_p2 = pnand %p615_p0, %p141_p1 }
   0x5   : > { %s169_s16 = smul.u32 (!%p142_p2), 14, %s767_s13  ;;  %p181_p4 = scmp.lt.s32.totalorder (!%p142_p2), %s767_s13, 3 }
   0x6   : > { %145 = sbr.rel (%p142_p2) target bundleno = 275 (0x113), region = 28 }
   0x7   : > { %p170_p3 = scmp.lt.s32.totalorder (!%p142_p2), %s169_s16, 55 }
   0xb   : > { %vm272_vm0 = vcmask 1044480   ;;  %v738_v0 = vmov 0.0   ;;  %v721_v1 = vld [vmem:[%s903_s1 + $0x8] sm:$0x3f]   ;;  %vm273_vm1 = vcmask 1045504   ;;  %v739_v2 = vmov 65535  }
   0xc   : > { %674 = vmatprep.subr.bf16.mxu0 %v738_v0  ;;  %706 = vmatprep.subr.bf16.mxu1 %v738_v0  ;;  %v274_v3 = vsel %vm272_vm0, 4294967295, %v739_v2  ;;  %vm740_vm2 = vmmov 0   ;;  %v722_v6 = vld [vmem:[%s903_s1] sm:$0xff]   ;;  %s907_s16 = smov (!%p170_p3, %s169_s16), 55  ;;  %vm250_vm3 = vcmask 220160   ;;  %vm424_vm4 = vcmask 519168  }
   0xd   : > { %v275_v4 = vsel %vm273_vm1, %v274_v3, 0  ;;  %678 = vmatprep.mubr.msk.bf16.mxu0 %vm740_vm2, %v738_v0  ;;  %694 = vmatprep.mubr.msk.bf16.mxu1 %vm740_vm2, %v738_v0  ;;  %s616_s19 = sshll.u32 %s907_s16, 2  ;;  %vm439_vm5 = vcmask 523264   ;;  %s909_s13 = smov (!%p181_p4, %s767_s13), 3  ;;  %vm520_vm6 = vcmask 1040384   ;;  %vm522_vm7 = vcmask 517120  }
   0xe   : > { %v277_v5 = vand.u32 %v721_v1, %v275_v4  ;;  %s173_s22 = scalar_lea.vmem %s902_s0, %s616_s19  ;;  %s801_s25 = scalar_lea.vmem %s904_s2, %s616_s19 }
   0xf   : > { %v723_v7 = vld [vmem:[%s173_s22] sm:$0xff]   ;;  %v724_v9 = vld [vmem:[%s173_s22 + $0x8] sm:$0xff]   ;;  %v726_v11 = vld [vmem:[%s173_s22 + $0x10] sm:$0xff]   ;;  %s618_s26 = sshll.u32 %s909_s13, 1 }
  0x10   : > { %675 = vmatpush3.bf16.msra.mxu0 %v277_v5  ;;  %708 = vmatpush3.bf16.msra.mxu1 %v277_v5  ;;  %v725_v8 = vld [vmem:[%s173_s22 + $0x20] sm:$0xff]   ;;  %v727_v10 = vld [vmem:[%s173_s22 + $0x28] sm:$0xff]   ;;  %v729_v12 = vld [vmem:[%s173_s22 + $0x30] sm:$0xff]   ;;  %s184_s29 = scalar_lea.vmem %s905_s3, %s618_s26 }
  0x11   : > { %676 = vmatprep.subr.bf16.mxu0 %v738_v0  ;;  %707 = vmatprep.subr.bf16.mxu1 %v738_v0  ;;  %v728_v13 = vld [vmem:[%s173_s22 + $0x18] sm:$0xff]  }
  0x14   : > { %677 = vmatpush3.bf16.msra.mxu0 %v722_v6  ;;  %709 = vmatpush3.bf16.msra.mxu1 %v722_v6 }
  0x17   : > { %679 = vmatmul.mubr.msk.bf16.vlgmr.msra.gmra.mxu0 %vm250_vm3, %v723_v7  ;;  %695 = vmatmul.mubr.msk.bf16.vlgmr.msra.gmra.mxu1 %vm250_vm3, %v725_v8 }
  0x18   : > { %682 = vmatprep.mubr.msk.bf16.mxu0 %vm740_vm2, %v738_v0  ;;  %698 = vmatprep.mubr.msk.bf16.mxu1 %vm740_vm2, %v738_v0 }
  0x1f   : > { %683 = vmatmul.mubr.msk.bf16.gmra.mxu0 %vm250_vm3, %v724_v9  ;;  %699 = vmatmul.mubr.msk.bf16.gmra.mxu1 %vm250_vm3, %v727_v10 }
  0x20   : > { %686 = vmatprep.mubr.msk.bf16.mxu0 %vm740_vm2, %v738_v0  ;;  %702 = vmatprep.mubr.msk.bf16.mxu1 %vm740_vm2, %v738_v0 }
  0x27   : > { %687 = vmatmul.mubr.msk.bf16.gmra.mxu0 %vm250_vm3, %v726_v11  ;;  %703 = vmatmul.mubr.msk.bf16.gmra.mxu1 %vm250_vm3, %v729_v12 }
  0x28   : > { %690 = vmatprep.mubr.msk.bf16.mxu0 %vm740_vm2, %v738_v0 }
  0x2f   : > { %691 = vmatmul.mubr.msk.bf16.gmra.mxu0 %vm250_vm3, %v728_v13 }
  0xd7   : > { %v313_v14 = vpop.f32.mrf.mxu0  ;;  %v803_v16 = vpop.f32.mrf.mxu1 }
  0xd8   : > { %v651_v15 = vpack.c.bf16 %v313_v14, %v313_v14  ;;  %v659_v18 = vpack.c.bf16 %v803_v16, %v803_v16  ;;  %v473_v38 = vmul.f32 %v313_v14, %v313_v14  ;;  %v440_v42 = vsel %vm439_vm5, %v313_v14, 0.0 }
  0xd9   : > { %v680_v17 = vpop.f32.mrf.mxu0  ;;  %v696_v19 = vpop.f32.mrf.mxu1 }
  0xda   : > { %425 = vst.msk [vmem:[%s801_s25] sm:$0xf] %vm424_vm4, %v651_v15  ;;  %433 = vst.msk [vmem:[%s801_s25 + $0x20] sm:$0xf] %vm424_vm4, %v659_v18  ;;  %v487_v52 = vsel %vm439_vm5, %v473_v38, 0.0 }
  0xdb   : > { %v316_v20 = vpop.f32.mrf.mxu0  ;;  %v811_v22 = vpop.f32.mrf.mxu1 }
  0xdc   : > { %v652_v21 = vpack.c.bf16 %v316_v20, %v316_v20  ;;  %v660_v24 = vpack.c.bf16 %v811_v22, %v811_v22  ;;  %v474_v33 = vmul.f32 %v316_v20, %v316_v20  ;;  %v441_v39 = vsel %vm439_vm5, %v316_v20, 0.0 }
  0xdd   : > { %v681_v23 = vpop.f32.mrf.mxu0  ;;  %v697_v25 = vpop.f32.mrf.mxu1  ;;  %v442_v49 = vadd.f32 %v441_v39, %v440_v42  ;;  %v457_v39 = vsel %vm439_vm5, %v811_v22, 0.0 }
  0xde   : > { %426 = vst.msk [vmem:[%s801_s25 + $0x4] sm:$0xf] %vm424_vm4, %v652_v21  ;;  %434 = vst.msk [vmem:[%s801_s25 + $0x24] sm:$0xf] %vm424_vm4, %v660_v24  ;;  %v488_v44 = vsel %vm439_vm5, %v474_v33, 0.0  ;;  %v481_v24 = vmul.f32 %v803_v16, %v803_v16  ;;  %v482_v33 = vmul.f32 %v811_v22, %v811_v22 }
  0xdf   : > { %v321_v26 = vpop.f32.mrf.mxu0  ;;  %v819_v28 = vpop.f32.mrf.mxu1  ;;  %v489_v57 = vadd.f32 %v488_v44, %v487_v52 }
  0xe0   : > { %v653_v27 = vpack.c.bf16 %v321_v26, %v321_v26  ;;  %v661_v30 = vpack.c.bf16 %v819_v28, %v819_v28  ;;  %v475_v40 = vmul.f32 %v321_v26, %v321_v26  ;;  %v443_v45 = vsel %vm439_vm5, %v321_v26, 0.0 }
  0xe1   : > { %v684_v29 = vpop.f32.mrf.mxu0  ;;  %v700_v31 = vpop.f32.mrf.mxu1  ;;  %v444_v58 = vadd.f32 %v443_v45, %v442_v49  ;;  %v502_v38 = vsel %vm439_vm5, %v481_v24, 0.0 }
  0xe2   : > { %427 = vst.msk [vmem:[%s801_s25 + $0x8] sm:$0xf] %vm424_vm4, %v653_v27  ;;  %435 = vst.msk [vmem:[%s801_s25 + $0x28] sm:$0xf] %vm424_vm4, %v661_v30  ;;  %v490_v53 = vsel %vm439_vm5, %v475_v40, 0.0  ;;  %v483_v40 = vmul.f32 %v819_v28, %v819_v28 }
  0xe3   : > { %v324_v32 = vpop.f32.mrf.mxu0  ;;  %v827_v35 = vpop.f32.mrf.mxu1  ;;  %v491_v1 = vadd.f32 %v490_v53, %v489_v57 }
  0xe4   : > { %v654_v34 = vpack.c.bf16 %v324_v32, %v324_v32  ;;  %v662_v37 = vpack.c.bf16 %v827_v35, %v827_v35  ;;  %v476_v46 = vmul.f32 %v324_v32, %v324_v32  ;;  %v445_v54 = vsel %vm439_vm5, %v324_v32, 0.0 }
  0xe5   : > { %v685_v36 = vpop.f32.mrf.mxu0  ;;  %v701_v41 = vpop.f32.mrf.mxu1  ;;  %v446_v2 = vadd.f32 %v445_v54, %v444_v58  ;;  %v455_v32 = vsel %vm439_vm5, %v803_v16, 0.0  ;;  %v504_v16 = vsel %vm439_vm5, %v482_v33, 0.0  ;;  %v484_v44 = vmul.f32 %v827_v35, %v827_v35 }
  0xe6   : > { %428 = vst.msk [vmem:[%s801_s25 + $0xc] sm:$0xf] %vm424_vm4, %v654_v34  ;;  %436 = vst.msk [vmem:[%s801_s25 + $0x2c] sm:$0xf] %vm424_vm4, %v662_v37  ;;  %v492_v60 = vsel %vm439_vm5, %v476_v46, 0.0  ;;  %v461_v22 = vsel %vm439_vm5, %v827_v35, 0.0 }
  0xe7   : > { %v329_v43 = vpop.f32.mrf.mxu0  ;;  %v839_v48 = vpop.f32.mrf.mxu1  ;;  %v493_v8 = vadd.f32 %v492_v60, %v491_v1  ;;  %v508_v52 = vsel %vm439_vm5, %v484_v44, 0.0 }
  0xe8   : > { %v655_v47 = vpack.c.bf16 %v329_v43, %v329_v43  ;;  %v663_v51 = vpack.c.bf16 %v839_v48, %v839_v48  ;;  %v477_v55 = vmul.f32 %v329_v43, %v329_v43  ;;  %v447_v61 = vsel %vm439_vm5, %v329_v43, 0.0 }
  0xe9   : > { %v688_v50 = vpop.f32.mrf.mxu0  ;;  %v704_v56 = vpop.f32.mrf.mxu1  ;;  %v448_v9 = vadd.f32 %v447_v61, %v446_v2  ;;  %v459_v43 = vsel %vm439_vm5, %v819_v28, 0.0  ;;  %v485_v49 = vmul.f32 %v839_v48, %v839_v48  ;;  %v463_v28 = vsel %vm439_vm5, %v839_v48, 0.0 }
  0xea   : > { %429 = vst.msk [vmem:[%s801_s25 + $0x10] sm:$0xf] %vm424_vm4, %v655_v47  ;;  %437 = vst.msk [vmem:[%s801_s25 + $0x30] sm:$0xf] %vm424_vm4, %v663_v51  ;;  %v494_v5 = vsel %vm439_vm5, %v477_v55, 0.0  ;;  %v506_v47 = vsel %vm439_vm5, %v483_v40, 0.0 }
  0xeb   : > { %v332_v59 = vpop.f32.mrf.mxu0  ;;  %v364_v0 = vpop.f32.mrf.mxu1  ;;  %v495_v15 = vadd.f32 %v494_v5, %v493_v8  ;;  %v510_v56 = vsel %vm439_vm5, %v485_v49, 0.0 }
  0xec   : > { %v656_v62 = vpack.c.bf16 %v332_v59, %v332_v59  ;;  %v478_v63 = vmul.f32 %v332_v59, %v332_v59  ;;  %v664_v4 = vpack.c.bf16 %v364_v0, %v364_v0  ;;  %v449_v6 = vsel %vm439_vm5, %v332_v59, 0.0 }
  0xed   : > { %v689_v3 = vpop.f32.mrf.mxu0  ;;  %v705_v7 = vpop.f32.mrf.mxu1  ;;  %v450_v17 = vadd.f32 %v449_v6, %v448_v9  ;;  %v486_v53 = vmul.f32 %v364_v0, %v364_v0  ;;  %v465_v57 = vsel %vm439_vm5, %v364_v0, 0.0 }
  0xee   : > { %430 = vst.msk [vmem:[%s801_s25 + $0x14] sm:$0xf] %vm424_vm4, %v656_v62  ;;  %438 = vst.msk [vmem:[%s801_s25 + $0x34] sm:$0xf] %vm424_vm4, %v664_v4  ;;  %v496_v11 = vsel %vm439_vm5, %v478_v63, 0.0 }
  0xef   : > { %v337_v10 = vpop.f32.mrf.mxu0  ;;  %v497_v20 = vadd.f32 %v496_v11, %v495_v15  ;;  %v512_v59 = vsel %vm439_vm5, %v486_v53, 0.0 }
  0xf0   : > { %v657_v12 = vpack.c.bf16 %v337_v10, %v337_v10  ;;  %v451_v13 = vsel %vm439_vm5, %v337_v10, 0.0  ;;  %v479_v14 = vmul.f32 %v337_v10, %v337_v10 }
  0xf1   : > { %v692_v18 = vpop.f32.mrf.mxu0  ;;  %v452_v21 = vadd.f32 %v451_v13, %v450_v17 }
  0xf2   : > { %431 = vst.msk [vmem:[%s801_s25 + $0x18] sm:$0xf] %vm424_vm4, %v657_v12  ;;  %v498_v19 = vsel %vm439_vm5, %v479_v14, 0.0 }
  0xf3   : > { %v340_v23 = vpop.f32.mrf.mxu0  ;;  %v499_v29 = vadd.f32 %v498_v19, %v497_v20 }
  0xf4   : > { %v658_v25 = vpack.c.bf16 %v340_v23, %v340_v23  ;;  %v453_v26 = vsel %vm439_vm5, %v340_v23, 0.0  ;;  %v480_v27 = vmul.f32 %v340_v23, %v340_v23 }
  0xf5   : > { %v454_v30 = vadd.f32 %v453_v26, %v452_v21  ;;  %v693_v31 = vpop.f32.mrf.mxu0 }
  0xf6   : > { %432 = vst.msk [vmem:[%s801_s25 + $0x1c] sm:$0xf] %vm424_vm4, %v658_v25  ;;  %v500_v34 = vsel %vm439_vm5, %v480_v27, 0.0 }
  0xf7   : > { %v456_v36 = vadd.f32 %v455_v32, %v454_v30  ;;  %v501_v37 = vadd.f32 %v500_v34, %v499_v29 }
  0xf9   : > { %v458_v41 = vadd.f32 %v457_v39, %v456_v36  ;;  %v503_v42 = vadd.f32 %v502_v38, %v501_v37 }
  0xfb   : > { %v505_v45 = vadd.f32 %v504_v16, %v503_v42  ;;  %v460_v46 = vadd.f32 %v459_v43, %v458_v41 }
  0xfd   : > { %v462_v50 = vadd.f32 %v461_v22, %v460_v46  ;;  %v507_v51 = vadd.f32 %v506_v47, %v505_v45 }
  0xff   : > { %v464_v54 = vadd.f32 %v463_v28, %v462_v50  ;;  %v509_v55 = vadd.f32 %v508_v52, %v507_v51 }
 0x101   : > { %v511_v35 = vadd.f32 %v510_v56, %v509_v55  ;;  %v466_v58 = vadd.f32 %v465_v57, %v464_v54 }
 0x103   : > { %v467_v60 = vrot.slane %v466_v58, 4  ;;  %v513_v61 = vadd.f32 %v512_v59, %v511_v35 }
 0x105   : > { %v468_v62 = vadd.f32 %v467_v60, %v466_v58  ;;  %v514_v63 = vrot.slane %v513_v61, 4 }
 0x107   : > { %v469_v1 = vrot.slane %v468_v62, 2  ;;  %v515_v2 = vadd.f32 %v514_v63, %v513_v61 }
 0x109   : > { %v470_v48 = vadd.f32 %v469_v1, %v468_v62  ;;  %v516_v3 = vrot.slane %v515_v2, 2 }
 0x10b   : > { %v471_v4 = vrot.slane %v470_v48, 1  ;;  %v517_v5 = vadd.f32 %v516_v3, %v515_v2 }
 0x10d   : > { %v518_v6 = vrot.slane %v517_v5, 1  ;;  %v472_v0 = vadd.f32 %v471_v4, %v470_v48 }
 0x10f   : > { %v519_v7 = vadd.f32 %v518_v6, %v517_v5 }
 0x111   : > { %v521_v8 = vsel %vm520_vm6, %v472_v0, %v519_v7 }
 0x112   : > { %523 = vst.msk [vmem:[%s184_s29] sm:$0x3] %vm522_vm7, %v521_v8 }
 0x113 PF: > { %s14_s12 = sadd.s32 1, %s736_s12  }
 0x114   : > { %p11_p5 = scmp.ge.s32.totalorder %s14_s12, 6  }
 0x116   :  { %13 = sbr.rel (!%p11_p5) target bundleno = 1 (0x1), region = 70 }

// kernel: cnn_encoder_forward.9
= control target key start
LH: loop header
LB: loop body
LE: loop exit
PB: predicated region body
PF: predicated region fallthrough
CT: control target
= control target key end

     0   :  { %vm481_vm0 = vcmask 519168   ;;  %s1026_s0 = inlined_call_operand.vmem [shape: bf16[448,64], index: 0, kind: input, shape index: {}, may-alias: {0,1,2,3}]   ;;  %s1027_s1 = inlined_call_operand.vmem [shape: bf16[448,64], index: 1, kind: input, shape index: {}, may-alias: {0,1,2,3}]   ;;  %s1028_s2 = inlined_call_operand.vmem [shape: bf16[448,64], index: 2, kind: input, shape index: {}, may-alias: {0,1,2,3}]   ;;  %s1029_s3 = inlined_call_operand.vmem [shape: bf16[448,64], index: 3, kind: input, shape index: {}, may-alias: {0,1,2,3}]   ;;  %s1030_s4 = inlined_call_operand.vmem [shape: f32[1,64], index: 4, kind: input, shape index: {}]   ;;  %s1031_s5 = inlined_call_operand.vmem [shape: f32[1,64], index: 5, kind: input, shape index: {}]   ;;  %s1032_s6 = inlined_call_operand.vmem [shape: bf16[112,64], index: 6, kind: output, shape index: {}]  }
   0x1   :  { %v767_v0 = vld [vmem:[%s1030_s4] ss:$0 sm:$0xff]  ;;  %v708_v3 = vld [vmem:[%s1027_s1 + $0x38] sm:$0xff]   ;;  %v715_v4 = vld [vmem:[%s1028_s2 + $0x70] sm:$0xff]  }
   0x2   :  { %v591_v1 = vld [vmem:[%s1026_s0] sm:$0xff]   ;;  %v722_v5 = vld [vmem:[%s1029_s3 + $0xa8] sm:$0xff]   ;;  %v620_v8 = vunpack.c.l.bf16 %v708_v3  ;;  %v648_v9 = vunpack.c.l.bf16 %v715_v4  ;;  %v621_v11 = vunpack.c.h.bf16 %v708_v3  ;;  %v649_v14 = vunpack.c.h.bf16 %v715_v4  ;;  %v716_v34 = vld [vmem:[%s1028_s2 + $0x78] sm:$0xff]  }
   0x3   :  { %v592_v2 = vunpack.c.l.bf16 %v591_v1  ;;  %v593_v6 = vunpack.c.h.bf16 %v591_v1  ;;  %v784_v7 = vld [vmem:[%s1031_s5] ss:$0 sm:$0xff]  ;;  %v676_v10 = vunpack.c.l.bf16 %v722_v5  ;;  %v677_v15 = vunpack.c.h.bf16 %v722_v5  ;;  %v702_v28 = vld [vmem:[%s1026_s0 + $0x8] sm:$0xff]   ;;  %v723_v39 = vld [vmem:[%s1029_s3 + $0xb0] sm:$0xff]  }
   0x4   :  { %v201_v16 = vmul.f32 %v620_v8, %v767_v0  ;;  %v271_v17 = vmul.f32 %v648_v9, %v767_v0  ;;  %v202_v19 = vmul.f32 %v621_v11, %v767_v0  ;;  %v272_v22 = vmul.f32 %v649_v14, %v767_v0  ;;  %v709_v29 = vld [vmem:[%s1027_s1 + $0x40] sm:$0xff]   ;;  %v703_v1 = vld [vmem:[%s1026_s0 + $0x10] sm:$0xff]  }
   0x5   :  { %v125_v12 = vmul.f32 %v592_v2, %v767_v0  ;;  %v126_v13 = vmul.f32 %v593_v6, %v767_v0  ;;  %v341_v18 = vmul.f32 %v676_v10, %v767_v0  ;;  %v342_v23 = vmul.f32 %v677_v15, %v767_v0  ;;  %v710_v6 = vld [vmem:[%s1027_s1 + $0x48] sm:$0xff]  }
   0x6   :  { %v215_v24 = vadd.f32 %v784_v7, %v201_v16  ;;  %v285_v25 = vadd.f32 %v784_v7, %v271_v17  ;;  %v216_v27 = vadd.f32 %v784_v7, %v202_v19  ;;  %v286_v32 = vadd.f32 %v784_v7, %v272_v22  ;;  %v724_v17 = vld [vmem:[%s1029_s3 + $0xb8] sm:$0xff]  }
   0x7   :  { %v145_v20 = vadd.f32 %v784_v7, %v125_v12  ;;  %v146_v21 = vadd.f32 %v784_v7, %v126_v13  ;;  %v355_v26 = vadd.f32 %v784_v7, %v341_v18  ;;  %v356_v33 = vadd.f32 %v784_v7, %v342_v23  ;;  %v717_v12 = vld [vmem:[%s1028_s2 + $0x80] sm:$0xff]  }
   0x8   :  { %v229_v35 = vmax.f32 %v215_v24, 0.0  ;;  %v299_v36 = vmax.f32 %v285_v25, 0.0  ;;  %v230_v38 = vmax.f32 %v216_v27, 0.0  ;;  %v300_v40 = vmax.f32 %v286_v32, 0.0 }
   0x9   :  { %v159_v30 = vmax.f32 %v145_v20, 0.0  ;;  %v160_v31 = vmax.f32 %v146_v21, 0.0  ;;  %v369_v37 = vmax.f32 %v355_v26, 0.0  ;;  %v370_v41 = vmax.f32 %v356_v33, 0.0 }
   0xa   :  { %v596_v42 = vunpack.c.l.bf16 %v702_v28  ;;  %v624_v43 = vunpack.c.l.bf16 %v709_v29  ;;  %v652_v47 = vunpack.c.l.bf16 %v716_v34  ;;  %v680_v51 = vunpack.c.l.bf16 %v723_v39 }
   0xb   :  { %v383_v44 = vmax.f32 %v159_v30, %v229_v35  ;;  %v397_v45 = vmax.f32 %v299_v36, %v369_v37  ;;  %v384_v46 = vmax.f32 %v160_v31, %v230_v38  ;;  %v398_v48 = vmax.f32 %v300_v40, %v370_v41 }
   0xc   :  { %v127_v49 = vmul.f32 %v596_v42, %v767_v0  ;;  %v203_v50 = vmul.f32 %v624_v43, %v767_v0  ;;  %v273_v53 = vmul.f32 %v652_v47, %v767_v0  ;;  %v597_v54 = vunpack.c.h.bf16 %v702_v28 }
   0xd   :  { %v411_v52 = vmax.f32 %v383_v44, %v397_v45  ;;  %v625_v55 = vunpack.c.h.bf16 %v709_v29  ;;  %v412_v56 = vmax.f32 %v384_v46, %v398_v48  ;;  %v343_v59 = vmul.f32 %v680_v51, %v767_v0  ;;  %v704_v46 = vld [vmem:[%s1026_s0 + $0x18] sm:$0xff]   ;;  %v711_v51 = vld [vmem:[%s1027_s1 + $0x50] sm:$0xff]  }
   0xe   :  { %v147_v57 = vadd.f32 %v784_v7, %v127_v49  ;;  %v217_v58 = vadd.f32 %v784_v7, %v203_v50  ;;  %v287_v61 = vadd.f32 %v784_v7, %v273_v53  ;;  %v128_v62 = vmul.f32 %v597_v54, %v767_v0 }
   0xf   :  { %v576_v60 = vpack.c.bf16 %v411_v52, %v411_v52  ;;  %v204_v63 = vmul.f32 %v625_v55, %v767_v0  ;;  %v577_v2 = vpack.c.bf16 %v412_v56, %v412_v56  ;;  %v357_v5 = vadd.f32 %v784_v7, %v343_v59 }
  0x10   :  { %v161_v3 = vmax.f32 %v147_v57, 0.0  ;;  %v231_v4 = vmax.f32 %v217_v58, 0.0  ;;  %v301_v8 = vmax.f32 %v287_v61, 0.0  ;;  %v148_v9 = vadd.f32 %v784_v7, %v128_v62 }
  0x11   :  { %482 = vst.msk [vmem:[%s1032_s6] sm:$0xf] %vm481_vm0, %v576_v60  ;;  %v218_v10 = vadd.f32 %v784_v7, %v204_v63  ;;  %v653_v11 = vunpack.c.h.bf16 %v716_v34  ;;  %483 = vst.msk [vmem:[%s1032_s6 + $0x4] sm:$0xf] %vm481_vm0, %v577_v2  ;;  %v371_v13 = vmax.f32 %v357_v5, 0.0  ;;  %v681_v15 = vunpack.c.h.bf16 %v723_v39  ;;  %v718_v60 = vld [vmem:[%s1028_s2 + $0x88] sm:$0xff]  }
  0x12   :  { %v385_v14 = vmax.f32 %v161_v3, %v231_v4  ;;  %v600_v16 = vunpack.c.l.bf16 %v703_v1  ;;  %v162_v18 = vmax.f32 %v148_v9, 0.0  ;;  %v628_v21 = vunpack.c.l.bf16 %v710_v6  ;;  %v725_v2 = vld [vmem:[%s1029_s3 + $0xc0] sm:$0xff]  }
  0x13   :  { %v232_v19 = vmax.f32 %v218_v10, 0.0  ;;  %v274_v20 = vmul.f32 %v653_v11, %v767_v0  ;;  %v399_v22 = vmax.f32 %v301_v8, %v371_v13  ;;  %v344_v23 = vmul.f32 %v681_v15, %v767_v0 }
  0x14   :  { %v129_v24 = vmul.f32 %v600_v16, %v767_v0  ;;  %v656_v25 = vunpack.c.l.bf16 %v717_v12  ;;  %v205_v28 = vmul.f32 %v628_v21, %v767_v0  ;;  %v684_v29 = vunpack.c.l.bf16 %v724_v17 }
  0x15   :  { %v288_v26 = vadd.f32 %v784_v7, %v274_v20  ;;  %v386_v27 = vmax.f32 %v162_v18, %v232_v19  ;;  %v413_v30 = vmax.f32 %v385_v14, %v399_v22  ;;  %v358_v31 = vadd.f32 %v784_v7, %v344_v23 }
  0x16   :  { %v149_v32 = vadd.f32 %v784_v7, %v129_v24  ;;  %v275_v33 = vmul.f32 %v656_v25, %v767_v0  ;;  %v219_v35 = vadd.f32 %v784_v7, %v205_v28  ;;  %v345_v36 = vmul.f32 %v684_v29, %v767_v0 }
  0x17   :  { %v302_v34 = vmax.f32 %v288_v26, 0.0  ;;  %v601_v37 = vunpack.c.h.bf16 %v703_v1  ;;  %v578_v38 = vpack.c.bf16 %v413_v30, %v413_v30  ;;  %v372_v39 = vmax.f32 %v358_v31, 0.0 }
  0x18   :  { %v163_v40 = vmax.f32 %v149_v32, 0.0  ;;  %v289_v41 = vadd.f32 %v784_v7, %v275_v33  ;;  %v233_v42 = vmax.f32 %v219_v35, 0.0  ;;  %v359_v43 = vadd.f32 %v784_v7, %v345_v36  ;;  %v705_v32 = vld [vmem:[%s1026_s0 + $0x20] sm:$0xff]   ;;  %v712_v33 = vld [vmem:[%s1027_s1 + $0x58] sm:$0xff]  }
  0x19   :  { %v130_v44 = vmul.f32 %v601_v37, %v767_v0  ;;  %v629_v45 = vunpack.c.h.bf16 %v710_v6  ;;  %484 = vst.msk [vmem:[%s1032_s6 + $0x8] sm:$0xf] %vm481_vm0, %v578_v38  ;;  %v400_v47 = vmax.f32 %v302_v34, %v372_v39  ;;  %v657_v49 = vunpack.c.h.bf16 %v717_v12  ;;  %v719_v38 = vld [vmem:[%s1028_s2 + $0x90] sm:$0xff]  }
  0x1a   :  { %v303_v48 = vmax.f32 %v289_v41, 0.0  ;;  %v685_v50 = vunpack.c.h.bf16 %v724_v17  ;;  %v373_v52 = vmax.f32 %v359_v43, 0.0  ;;  %v387_v53 = vmax.f32 %v163_v40, %v233_v42 }
  0x1b   :  { %v150_v54 = vadd.f32 %v784_v7, %v130_v44  ;;  %v206_v55 = vmul.f32 %v629_v45, %v767_v0  ;;  %v414_v56 = vmax.f32 %v386_v27, %v400_v47  ;;  %v276_v57 = vmul.f32 %v657_v49, %v767_v0  ;;  %v726_v47 = vld [vmem:[%s1029_s3 + $0xc8] sm:$0xff]  }
  0x1c   :  { %v346_v58 = vmul.f32 %v685_v50, %v767_v0  ;;  %v604_v59 = vunpack.c.l.bf16 %v704_v46  ;;  %v401_v61 = vmax.f32 %v303_v48, %v373_v52  ;;  %v632_v1 = vunpack.c.l.bf16 %v711_v51 }
  0x1d   :  { %v164_v62 = vmax.f32 %v150_v54, 0.0  ;;  %v220_v63 = vadd.f32 %v784_v7, %v206_v55  ;;  %v579_v3 = vpack.c.bf16 %v414_v56, %v414_v56  ;;  %v290_v4 = vadd.f32 %v784_v7, %v276_v57 }
  0x1e   :  { %v360_v5 = vadd.f32 %v784_v7, %v346_v58  ;;  %v131_v6 = vmul.f32 %v604_v59, %v767_v0  ;;  %v415_v8 = vmax.f32 %v387_v53, %v401_v61  ;;  %v207_v10 = vmul.f32 %v632_v1, %v767_v0 }
  0x1f   :  { %v234_v9 = vmax.f32 %v220_v63, 0.0  ;;  %v660_v11 = vunpack.c.l.bf16 %v718_v60  ;;  %485 = vst.msk [vmem:[%s1032_s6 + $0xc] sm:$0xf] %vm481_vm0, %v579_v3  ;;  %v304_v12 = vmax.f32 %v290_v4, 0.0  ;;  %v688_v15 = vunpack.c.l.bf16 %v725_v2 }
  0x20   :  { %v374_v13 = vmax.f32 %v360_v5, 0.0  ;;  %v151_v14 = vadd.f32 %v784_v7, %v131_v6  ;;  %v580_v16 = vpack.c.bf16 %v415_v8, %v415_v8  ;;  %v221_v18 = vadd.f32 %v784_v7, %v207_v10  ;;  %v706_v10 = vld [vmem:[%s1026_s0 + $0x28] sm:$0xff]  }
  0x21   :  { %v388_v17 = vmax.f32 %v164_v62, %v234_v9  ;;  %v277_v19 = vmul.f32 %v660_v11, %v767_v0  ;;  %v347_v22 = vmul.f32 %v688_v15, %v767_v0  ;;  %v605_v23 = vunpack.c.h.bf16 %v704_v46  ;;  %v713_v15 = vld [vmem:[%s1027_s1 + $0x60] sm:$0xff]  }
  0x22   :  { %v402_v20 = vmax.f32 %v304_v12, %v374_v13  ;;  %v165_v21 = vmax.f32 %v151_v14, 0.0  ;;  %486 = vst.msk [vmem:[%s1032_s6 + $0x10] sm:$0xf] %vm481_vm0, %v580_v16  ;;  %v235_v24 = vmax.f32 %v221_v18, 0.0  ;;  %v633_v26 = vunpack.c.h.bf16 %v711_v51 }
  0x23   :  { %v291_v25 = vadd.f32 %v784_v7, %v277_v19  ;;  %v661_v27 = vunpack.c.h.bf16 %v718_v60  ;;  %v361_v29 = vadd.f32 %v784_v7, %v347_v22  ;;  %v132_v30 = vmul.f32 %v605_v23, %v767_v0 }
  0x24   :  { %v416_v28 = vmax.f32 %v388_v17, %v402_v20  ;;  %v689_v31 = vunpack.c.h.bf16 %v725_v2  ;;  %v389_v35 = vmax.f32 %v165_v21, %v235_v24  ;;  %v208_v36 = vmul.f32 %v633_v26, %v767_v0  ;;  %v720_v20 = vld [vmem:[%s1028_s2 + $0x98] sm:$0xff]  }
  0x25   :  { %v305_v34 = vmax.f32 %v291_v25, 0.0  ;;  %v278_v37 = vmul.f32 %v661_v27, %v767_v0  ;;  %v375_v40 = vmax.f32 %v361_v29, 0.0  ;;  %v152_v41 = vadd.f32 %v784_v7, %v132_v30  ;;  %v727_v25 = vld [vmem:[%s1029_s3 + $0xd0] sm:$0xff]  }
  0x26   :  { %v581_v39 = vpack.c.bf16 %v416_v28, %v416_v28  ;;  %v348_v42 = vmul.f32 %v689_v31, %v767_v0  ;;  %v222_v43 = vadd.f32 %v784_v7, %v208_v36  ;;  %v608_v45 = vunpack.c.l.bf16 %v705_v32 }
  0x27   :  { %v292_v44 = vadd.f32 %v784_v7, %v278_v37  ;;  %v636_v46 = vunpack.c.l.bf16 %v712_v33  ;;  %v403_v48 = vmax.f32 %v305_v34, %v375_v40  ;;  %v166_v49 = vmax.f32 %v152_v41, 0.0 }
  0x28   :  { %487 = vst.msk [vmem:[%s1032_s6 + $0x14] sm:$0xf] %vm481_vm0, %v581_v39  ;;  %v362_v50 = vadd.f32 %v784_v7, %v348_v42  ;;  %v664_v51 = vunpack.c.l.bf16 %v719_v38  ;;  %v236_v52 = vmax.f32 %v222_v43, 0.0  ;;  %v133_v54 = vmul.f32 %v608_v45, %v767_v0 }
  0x29   :  { %v306_v53 = vmax.f32 %v292_v44, 0.0  ;;  %v209_v55 = vmul.f32 %v636_v46, %v767_v0  ;;  %v417_v56 = vmax.f32 %v389_v35, %v403_v48  ;;  %v692_v59 = vunpack.c.l.bf16 %v726_v47 }
  0x2a   :  { %v376_v57 = vmax.f32 %v362_v50, 0.0  ;;  %v279_v58 = vmul.f32 %v664_v51, %v767_v0  ;;  %v390_v60 = vmax.f32 %v166_v49, %v236_v52  ;;  %v153_v61 = vadd.f32 %v784_v7, %v133_v54  ;;  %v707_v54 = vld [vmem:[%s1026_s0 + $0x30] sm:$0xff]  }
  0x2b   :  { %v223_v62 = vadd.f32 %v784_v7, %v209_v55  ;;  %v609_v63 = vunpack.c.h.bf16 %v705_v32  ;;  %v582_v1 = vpack.c.bf16 %v417_v56, %v417_v56  ;;  %v349_v4 = vmul.f32 %v692_v59, %v767_v0  ;;  %v714_v59 = vld [vmem:[%s1027_s1 + $0x68] sm:$0xff]  }
  0x2c   :  { %v404_v2 = vmax.f32 %v306_v53, %v376_v57  ;;  %v293_v3 = vadd.f32 %v784_v7, %v279_v58  ;;  %v167_v5 = vmax.f32 %v153_v61, 0.0  ;;  %v637_v9 = vunpack.c.h.bf16 %v712_v33 }
  0x2d   :  { %v237_v6 = vmax.f32 %v223_v62, 0.0  ;;  %v134_v8 = vmul.f32 %v609_v63, %v767_v0  ;;  %488 = vst.msk [vmem:[%s1032_s6 + $0x18] sm:$0xf] %vm481_vm0, %v582_v1  ;;  %v363_v13 = vadd.f32 %v784_v7, %v349_v4  ;;  %v665_v14 = vunpack.c.h.bf16 %v719_v38 }
  0x2e   :  { %v418_v11 = vmax.f32 %v390_v60, %v404_v2  ;;  %v307_v12 = vmax.f32 %v293_v3, 0.0  ;;  %v210_v18 = vmul.f32 %v637_v9, %v767_v0  ;;  %v693_v19 = vunpack.c.h.bf16 %v726_v47 }
  0x2f   :  { %v391_v16 = vmax.f32 %v167_v5, %v237_v6  ;;  %v154_v17 = vadd.f32 %v784_v7, %v134_v8  ;;  %v377_v22 = vmax.f32 %v363_v13, 0.0  ;;  %v280_v23 = vmul.f32 %v665_v14, %v767_v0  ;;  %v721_v5 = vld [vmem:[%s1028_s2 + $0xa0] sm:$0xff]  }
  0x30   :  { %v583_v21 = vpack.c.bf16 %v418_v11, %v418_v11  ;;  %v612_v24 = vunpack.c.l.bf16 %v706_v10  ;;  %v224_v27 = vadd.f32 %v784_v7, %v210_v18  ;;  %v350_v28 = vmul.f32 %v693_v19, %v767_v0  ;;  %v728_v11 = vld [vmem:[%s1029_s3 + $0xd8] sm:$0xff]  }
  0x31   :  { %v168_v26 = vmax.f32 %v154_v17, 0.0  ;;  %v640_v29 = vunpack.c.l.bf16 %v713_v15  ;;  %v405_v30 = vmax.f32 %v307_v12, %v377_v22  ;;  %v294_v31 = vadd.f32 %v784_v7, %v280_v23 }
  0x32   :  { %489 = vst.msk [vmem:[%s1032_s6 + $0x1c] sm:$0xf] %vm481_vm0, %v583_v21  ;;  %v135_v32 = vmul.f32 %v612_v24, %v767_v0  ;;  %v668_v33 = vunpack.c.l.bf16 %v720_v20  ;;  %v238_v34 = vmax.f32 %v224_v27, 0.0  ;;  %v364_v35 = vadd.f32 %v784_v7, %v350_v28 }
  0x33   :  { %v211_v36 = vmul.f32 %v640_v29, %v767_v0  ;;  %v696_v37 = vunpack.c.l.bf16 %v727_v25  ;;  %v419_v38 = vmax.f32 %v391_v16, %v405_v30  ;;  %v308_v39 = vmax.f32 %v294_v31, 0.0 }
  0x34   :  { %v155_v40 = vadd.f32 %v784_v7, %v135_v32  ;;  %v281_v41 = vmul.f32 %v668_v33, %v767_v0  ;;  %v378_v42 = vmax.f32 %v364_v35, 0.0  ;;  %v392_v43 = vmax.f32 %v168_v26, %v238_v34 }
  0x35   :  { %v225_v44 = vadd.f32 %v784_v7, %v211_v36  ;;  %v351_v45 = vmul.f32 %v696_v37, %v767_v0  ;;  %v584_v46 = vpack.c.bf16 %v419_v38, %v419_v38  ;;  %v613_v49 = vunpack.c.h.bf16 %v706_v10 }
  0x36   :  { %v169_v47 = vmax.f32 %v155_v40, 0.0  ;;  %v295_v48 = vadd.f32 %v784_v7, %v281_v41  ;;  %v406_v50 = vmax.f32 %v308_v39, %v378_v42  ;;  %v641_v53 = vunpack.c.h.bf16 %v713_v15 }
  0x37   :  { %v239_v51 = vmax.f32 %v225_v44, 0.0  ;;  %v365_v52 = vadd.f32 %v784_v7, %v351_v45  ;;  %490 = vst.msk [vmem:[%s1032_s6 + $0x20] sm:$0xf] %vm481_vm0, %v584_v46  ;;  %v136_v56 = vmul.f32 %v613_v49, %v767_v0  ;;  %v669_v57 = vunpack.c.h.bf16 %v720_v20 }
  0x38   :  { %v309_v55 = vmax.f32 %v295_v48, 0.0  ;;  %v697_v58 = vunpack.c.h.bf16 %v727_v25  ;;  %v420_v60 = vmax.f32 %v392_v43, %v406_v50  ;;  %v212_v63 = vmul.f32 %v641_v53, %v767_v0 }
  0x39   :  { %v379_v61 = vmax.f32 %v365_v52, 0.0  ;;  %v393_v62 = vmax.f32 %v169_v47, %v239_v51  ;;  %v156_v1 = vadd.f32 %v784_v7, %v136_v56  ;;  %v282_v2 = vmul.f32 %v669_v57, %v767_v0 }
  0x3a   :  { %v352_v3 = vmul.f32 %v697_v58, %v767_v0  ;;  %v616_v4 = vunpack.c.l.bf16 %v707_v54  ;;  %v585_v6 = vpack.c.bf16 %v420_v60, %v420_v60  ;;  %v226_v9 = vadd.f32 %v784_v7, %v212_v63 }
  0x3b   :  { %v407_v8 = vmax.f32 %v309_v55, %v379_v61  ;;  %v644_v10 = vunpack.c.l.bf16 %v714_v59  ;;  %v170_v12 = vmax.f32 %v156_v1, 0.0  ;;  %v296_v13 = vadd.f32 %v784_v7, %v282_v2 }
  0x3c   :  { %v366_v14 = vadd.f32 %v784_v7, %v352_v3  ;;  %v137_v15 = vmul.f32 %v616_v4, %v767_v0  ;;  %491 = vst.msk [vmem:[%s1032_s6 + $0x24] sm:$0xf] %vm481_vm0, %v585_v6  ;;  %v240_v17 = vmax.f32 %v226_v9, 0.0  ;;  %v672_v19 = vunpack.c.l.bf16 %v721_v5 }
  0x3d   :  { %v421_v16 = vmax.f32 %v393_v62, %v407_v8  ;;  %v213_v18 = vmul.f32 %v644_v10, %v767_v0  ;;  %v310_v20 = vmax.f32 %v296_v13, 0.0  ;;  %v700_v23 = vunpack.c.l.bf16 %v728_v11 }
  0x3e   :  { %v380_v21 = vmax.f32 %v366_v14, 0.0  ;;  %v157_v22 = vadd.f32 %v784_v7, %v137_v15  ;;  %v394_v25 = vmax.f32 %v170_v12, %v240_v17  ;;  %v283_v27 = vmul.f32 %v672_v19, %v767_v0 }
  0x3f   :  { %v586_v24 = vpack.c.bf16 %v421_v16, %v421_v16  ;;  %v227_v26 = vadd.f32 %v784_v7, %v213_v18  ;;  %v353_v30 = vmul.f32 %v700_v23, %v767_v0  ;;  %v617_v31 = vunpack.c.h.bf16 %v707_v54 }
  0x40   :  { %v408_v28 = vmax.f32 %v310_v20, %v380_v21  ;;  %v171_v29 = vmax.f32 %v157_v22, 0.0  ;;  %v297_v33 = vadd.f32 %v784_v7, %v283_v27  ;;  %v645_v34 = vunpack.c.h.bf16 %v714_v59 }
  0x41   :  { %492 = vst.msk [vmem:[%s1032_s6 + $0x28] sm:$0xf] %vm481_vm0, %v586_v24  ;;  %v241_v32 = vmax.f32 %v227_v26, 0.0  ;;  %v673_v35 = vunpack.c.h.bf16 %v721_v5  ;;  %v367_v37 = vadd.f32 %v784_v7, %v353_v30  ;;  %v138_v38 = vmul.f32 %v617_v31, %v767_v0 }
  0x42   :  { %v422_v36 = vmax.f32 %v394_v25, %v408_v28  ;;  %v701_v39 = vunpack.c.h.bf16 %v728_v11  ;;  %v311_v40 = vmax.f32 %v297_v33, 0.0  ;;  %v214_v42 = vmul.f32 %v645_v34, %v767_v0 }
  0x43   :  { %v395_v41 = vmax.f32 %v171_v29, %v241_v32  ;;  %v284_v43 = vmul.f32 %v673_v35, %v767_v0  ;;  %v381_v45 = vmax.f32 %v367_v37, 0.0  ;;  %v158_v46 = vadd.f32 %v784_v7, %v138_v38 }
  0x44   :  { %v587_v44 = vpack.c.bf16 %v422_v36, %v422_v36  ;;  %v354_v47 = vmul.f32 %v701_v39, %v767_v0  ;;  %v228_v48 = vadd.f32 %v784_v7, %v214_v42 }
  0x45   :  { %v298_v49 = vadd.f32 %v784_v7, %v284_v43  ;;  %v409_v50 = vmax.f32 %v311_v40, %v381_v45  ;;  %v172_v51 = vmax.f32 %v158_v46, 0.0 }
  0x46   :  { %493 = vst.msk [vmem:[%s1032_s6 + $0x2c] sm:$0xf] %vm481_vm0, %v587_v44  ;;  %v368_v52 = vadd.f32 %v784_v7, %v354_v47  ;;  %v242_v53 = vmax.f32 %v228_v48, 0.0 }
  0x47   :  { %v312_v54 = vmax.f32 %v298_v49, 0.0  ;;  %v423_v55 = vmax.f32 %v395_v41, %v409_v50 }
  0x48   :  { %v382_v56 = vmax.f32 %v368_v52, 0.0  ;;  %v396_v57 = vmax.f32 %v172_v51, %v242_v53 }
  0x49   :  { %v588_v58 = vpack.c.bf16 %v423_v55, %v423_v55 }
  0x4a   :  { %v410_v0 = vmax.f32 %v312_v54, %v382_v56 }
  0x4b   :  { %494 = vst.msk [vmem:[%s1032_s6 + $0x30] sm:$0xf] %vm481_vm0, %v588_v58 }
  0x4c   :  { %v424_v59 = vmax.f32 %v396_v57, %v410_v0 }
  0x4e   :  { %v589_v60 = vpack.c.bf16 %v424_v59, %v424_v59 }
  0x50   :  { %495 = vst.msk [vmem:[%s1032_s6 + $0x34] sm:$0xf] %vm481_vm0, %v589_v60 }

// kernel: cnn_encoder_forward.11
= control target key start
LH: loop header
LB: loop body
LE: loop exit
PB: predicated region body
PF: predicated region fallthrough
CT: control target
= control target key end

     0   :  { %vm157_vm0 = vcmask 519168   ;;  %s272_s0 = inlined_call_operand.vmem [shape: bf16[96,64], index: 0, kind: input, shape index: {}, may-alias: {0,1,2,3}]   ;;  %s273_s1 = inlined_call_operand.vmem [shape: bf16[96,64], index: 1, kind: input, shape index: {}, may-alias: {0,1,2,3}]   ;;  %s274_s2 = inlined_call_operand.vmem [shape: bf16[96,64], index: 2, kind: input, shape index: {}, may-alias: {0,1,2,3}]   ;;  %s275_s3 = inlined_call_operand.vmem [shape: bf16[96,64], index: 3, kind: input, shape index: {}, may-alias: {0,1,2,3}]   ;;  %s276_s4 = inlined_call_operand.vmem [shape: f32[1,64], index: 4, kind: input, shape index: {}]   ;;  %s277_s5 = inlined_call_operand.vmem [shape: f32[1,64], index: 5, kind: input, shape index: {}]   ;;  %s278_s6 = inlined_call_operand.vmem [shape: bf16[16,64], index: 6, kind: output, shape index: {}]  }
   0x1   :  { %v182_v0 = vld [vmem:[%s276_s4] ss:$0 sm:$0xff]  ;;  %v210_v3 = vld [vmem:[%s273_s1 + $0x8] sm:$0xff]   ;;  %v211_v4 = vld [vmem:[%s274_s2 + $0x10] sm:$0xff]  }
   0x2   :  { %v195_v1 = vld [vmem:[%s272_s0] sm:$0xff]   ;;  %v212_v5 = vld [vmem:[%s275_s3 + $0x18] sm:$0xff]   ;;  %v200_v8 = vunpack.c.l.bf16 %v210_v3  ;;  %v204_v9 = vunpack.c.l.bf16 %v211_v4  ;;  %v201_v11 = vunpack.c.h.bf16 %v210_v3  ;;  %v205_v14 = vunpack.c.h.bf16 %v211_v4 }
   0x3   :  { %v196_v2 = vunpack.c.l.bf16 %v195_v1  ;;  %v197_v6 = vunpack.c.h.bf16 %v195_v1  ;;  %v183_v7 = vld [vmem:[%s277_s5] ss:$0 sm:$0xff]  ;;  %v208_v10 = vunpack.c.l.bf16 %v212_v5  ;;  %v209_v15 = vunpack.c.h.bf16 %v212_v5 }
   0x4   :  { %v117_v16 = vmul.f32 %v200_v8, %v182_v0  ;;  %v127_v17 = vmul.f32 %v204_v9, %v182_v0  ;;  %v118_v19 = vmul.f32 %v201_v11, %v182_v0  ;;  %v128_v22 = vmul.f32 %v205_v14, %v182_v0 }
   0x5   :  { %v101_v12 = vmul.f32 %v196_v2, %v182_v0  ;;  %v102_v13 = vmul.f32 %v197_v6, %v182_v0  ;;  %v137_v18 = vmul.f32 %v208_v10, %v182_v0  ;;  %v138_v23 = vmul.f32 %v209_v15, %v182_v0 }
   0x6   :  { %v119_v24 = vadd.f32 %v183_v7, %v117_v16  ;;  %v129_v25 = vadd.f32 %v183_v7, %v127_v17  ;;  %v120_v27 = vadd.f32 %v183_v7, %v118_v19  ;;  %v130_v30 = vadd.f32 %v183_v7, %v128_v22 }
   0x7   :  { %v109_v20 = vadd.f32 %v183_v7, %v101_v12  ;;  %v110_v21 = vadd.f32 %v183_v7, %v102_v13  ;;  %v139_v26 = vadd.f32 %v183_v7, %v137_v18  ;;  %v140_v31 = vadd.f32 %v183_v7, %v138_v23 }
   0x8   :  { %v121_v32 = vmax.f32 %v119_v24, 0.0  ;;  %v131_v33 = vmax.f32 %v129_v25, 0.0  ;;  %v122_v35 = vmax.f32 %v120_v27, 0.0  ;;  %v132_v36 = vmax.f32 %v130_v30, 0.0 }
   0x9   :  { %v111_v28 = vmax.f32 %v109_v20, 0.0  ;;  %v112_v29 = vmax.f32 %v110_v21, 0.0  ;;  %v141_v34 = vmax.f32 %v139_v26, 0.0  ;;  %v142_v37 = vmax.f32 %v140_v31, 0.0 }
   0xb   :  { %v143_v38 = vmax.f32 %v111_v28, %v121_v32  ;;  %v145_v39 = vmax.f32 %v131_v33, %v141_v34  ;;  %v144_v40 = vmax.f32 %v112_v29, %v122_v35  ;;  %v146_v41 = vmax.f32 %v132_v36, %v142_v37 }
   0xd   :  { %v147_v42 = vmax.f32 %v143_v38, %v145_v39  ;;  %v148_v43 = vmax.f32 %v144_v40, %v146_v41 }
   0xf   :  { %v192_v44 = vpack.c.bf16 %v147_v42, %v147_v42  ;;  %v193_v45 = vpack.c.bf16 %v148_v43, %v148_v43 }
  0x11   :  { %158 = vst.msk [vmem:[%s278_s6] sm:$0xf] %vm157_vm0, %v192_v44  ;;  %159 = vst.msk [vmem:[%s278_s6 + $0x4] sm:$0xf] %vm157_vm0, %v193_v45 }

// kernel: cnn_encoder_forward.10
= control target key start
LH: loop header
LB: loop body
LE: loop exit
PB: predicated region body
PF: predicated region fallthrough
CT: control target
= control target key end

     0   :  { %s960_s12 = smov 0   ;;  %s1102_s0 = inlined_call_operand.vmem [shape: bf16[96,576], index: 0, kind: input, shape index: {}]   ;;  %s1103_s1 = inlined_call_operand.vmem [shape: bf16[576,64], index: 1, kind: input, shape index: {}]   ;;  %s1104_s2 = inlined_call_operand.vmem [shape: bf16[96,64], index: 2, kind: output, shape index: {0}]   ;;  %s1105_s3 = inlined_call_operand.vmem [shape: f32[6,2,64], index: 3, kind: output, shape index: {1}]  }
   0x1 LB: > { %s966_s13 = sadd.s32 4294967295, %s936_s12   ;;  %p761_p0 = scmp.ge.s32.totalorder %s936_s12, 1  ;;  %s936_s12 = sphi %s960_s12, %s14_s12  }
   0x2   : > { %p142_p1 = scmp.lt.s32.totalorder %s936_s12, 7 }
   0x4   : > { %p143_p2 = pnand %p761_p0, %p142_p1 }
   0x5   : > { %s762_s19 = sshll.u32 (!%p143_p2), %s966_s13, 1  ;;  %p184_p4 = scmp.lt.s32.totalorder (!%p143_p2), %s966_s13, 5 }
   0x6   : > { %146 = sbr.rel (%p143_p2) target bundleno = 279 (0x117), region = 28  ;;  %p172_p3 = scmp.lt.s32.totalorder (!%p143_p2), %s762_s19, 11 }
   0xb   : > { %v887_v0 = vld [vmem:[%s1103_s1 + $0x78] sm:$0xff]   ;;  %v891_v4 = vld [vmem:[%s1103_s1 + $0x70] sm:$0xff]   ;;  %v895_v8 = vld [vmem:[%s1103_s1 + $0x68] sm:$0xff]   ;;  %s1107_s19 = smov (!%p172_p3, %s762_s19), 11  ;;  %v938_v34 = vmov 0.0   ;;  %vm939_vm0 = vmmov 0  }
   0xc   : > { %v888_v1 = vld [vmem:[%s1103_s1 + $0xf8] sm:$0xff]   ;;  %815 = vmatprep.subr.bf16.mxu0 %v887_v0  ;;  %v892_v5 = vld [vmem:[%s1103_s1 + $0xf0] sm:$0xff]   ;;  %v896_v9 = vld [vmem:[%s1103_s1 + $0xe8] sm:$0xff]   ;;  %s876_s17 = smul.u32 20, %s1107_s19  ;;  %vm508_vm1 = vcmask 523264   ;;  %vm643_vm2 = vcmask 519168  }
   0xd   : > { %v889_v2 = vld [vmem:[%s1103_s1 + $0x38] sm:$0xff]   ;;  %837 = vmatprep.subr.bf16.mxu1 %v888_v1  ;;  %v893_v6 = vld [vmem:[%s1103_s1 + $0x30] sm:$0xff]   ;;  %v897_v10 = vld [vmem:[%s1103_s1 + $0x28] sm:$0xff]   ;;  %s1109_s13 = smov (!%p184_p4, %s966_s13), 5  ;;  %vm666_vm3 = vcmask 1040384   ;;  %vm668_vm4 = vcmask 517120  }
   0xe   : > { %v890_v3 = vld [vmem:[%s1103_s1 + $0xb8] sm:$0xff]   ;;  %816 = vmatpush3.bf16.msra.mxu0 %v889_v2  ;;  %v894_v7 = vld [vmem:[%s1103_s1 + $0xb0] sm:$0xff]   ;;  %v898_v11 = vld [vmem:[%s1103_s1 + $0xa8] sm:$0xff]   ;;  %s176_s29 = scalar_lea.vmem %s1102_s0, %s876_s17  ;;  %s765_s17 = sshll.u32 %s1107_s19, 2 }
   0xf   : > { %838 = vmatpush3.bf16.msra.mxu1 %v890_v3  ;;  %817 = vmatprep.subr.bf16.mxu0 %v891_v4  ;;  %v899_v12 = vld [vmem:[%s1103_s1 + $0x60] sm:$0xff]   ;;  %v903_v16 = vld [vmem:[%s1103_s1 + $0x58] sm:$0xff]   ;;  %v907_v20 = vld [vmem:[%s1103_s1 + $0x50] sm:$0xff]   ;;  %s182_s21 = scalar_lea.vmem %s1104_s2, %s765_s17  ;;  %s766_s19 = sshll.u32 %s1109_s13, 1 }
  0x10   : > { %839 = vmatprep.subr.bf16.mxu1 %v892_v5  ;;  %v900_v13 = vld [vmem:[%s1103_s1 + $0xe0] sm:$0xff]   ;;  %v904_v17 = vld [vmem:[%s1103_s1 + $0xd8] sm:$0xff]   ;;  %v908_v21 = vld [vmem:[%s1103_s1 + $0xd0] sm:$0xff]   ;;  %s187_s24 = scalar_lea.vmem %s1105_s3, %s766_s19 }
  0x11   : > { %v901_v14 = vld [vmem:[%s1103_s1 + $0x20] sm:$0xff]   ;;  %v905_v18 = vld [vmem:[%s1103_s1 + $0x18] sm:$0xff]   ;;  %v909_v22 = vld [vmem:[%s1103_s1 + $0x10] sm:$0xff]  }
  0x12   : > { %818 = vmatpush3.bf16.msra.mxu0 %v893_v6  ;;  %v902_v15 = vld [vmem:[%s1103_s1 + $0xa0] sm:$0xff]   ;;  %v906_v19 = vld [vmem:[%s1103_s1 + $0x98] sm:$0xff]   ;;  %v910_v23 = vld [vmem:[%s1103_s1 + $0x90] sm:$0xff]  }
  0x13   : > { %840 = vmatpush3.bf16.msra.mxu1 %v894_v7  ;;  %819 = vmatprep.subr.bf16.mxu0 %v895_v8  ;;  %v911_v24 = vld [vmem:[%s1103_s1 + $0x48] sm:$0xff]   ;;  %v915_v28 = vld [vmem:[%s1103_s1 + $0x40] sm:$0xff]   ;;  %v925_v37 = vld [vmem:[%s1103_s1 + $0x118] sm:$0xff]  }
  0x14   : > { %841 = vmatprep.subr.bf16.mxu1 %v896_v9  ;;  %v912_v25 = vld [vmem:[%s1103_s1 + $0xc8] sm:$0xff]   ;;  %v916_v29 = vld [vmem:[%s1103_s1 + $0xc0] sm:$0xff]   ;;  %v926_v38 = vld [vmem:[%s1103_s1 + $0x110] sm:$0xff]  }
  0x15   : > { %v913_v26 = vld [vmem:[%s1103_s1 + $0x8] sm:$0xff]   ;;  %v917_v30 = vld [vmem:[%s1103_s1] sm:$0xff]  }
  0x16   : > { %820 = vmatpush3.bf16.msra.mxu0 %v897_v10  ;;  %v914_v27 = vld [vmem:[%s1103_s1 + $0x88] sm:$0xff]   ;;  %v918_v31 = vld [vmem:[%s1103_s1 + $0x80] sm:$0xff]  }
  0x17   : > { %842 = vmatpush3.bf16.msra.mxu1 %v898_v11  ;;  %821 = vmatprep.subr.bf16.mxu0 %v899_v12  ;;  %v919_v32 = vld [vmem:[%s176_s29] ss:$20 sps:$4 sm:$0xff]   ;;  %v921_v33 = vld [vmem:[%s176_s29 + $0x4] ss:$20 sps:$4 sm:$0xff]   ;;  %v922_v35 = vld [vmem:[%s176_s29 + $0x8] ss:$20 sps:$4 sm:$0xff]  }
  0x18   : > { %843 = vmatprep.subr.bf16.mxu1 %v900_v13  ;;  %v924_v36 = vld [vmem:[%s176_s29 + $0xc] ss:$20 sps:$4 sm:$0xff]   ;;  %544 = vmatprep.mubr.bf16.mxu0 %v921_v33  ;;  %v929_v41 = vld [vmem:[%s176_s29 + $0x10] ss:$20 sps:$4 sm:$0xff]  }
  0x19   : > { %585 = vmatprep.mubr.bf16.mxu1 %v924_v36  ;;  %v927_v39 = vld [vmem:[%s1103_s1 + $0x108] sm:$0xff]   ;;  %v928_v40 = vld [vmem:[%s1103_s1 + $0x100] sm:$0xff]  }
  0x1a   : > { %822 = vmatpush3.bf16.msra.mxu0 %v901_v14 }
  0x1b   : > { %844 = vmatpush3.bf16.msra.mxu1 %v902_v15  ;;  %823 = vmatprep.subr.bf16.mxu0 %v903_v16 }
  0x1c   : > { %845 = vmatprep.subr.bf16.mxu1 %v904_v17 }
  0x1e   : > { %824 = vmatpush3.bf16.msra.mxu0 %v905_v18 }
  0x1f   : > { %846 = vmatpush3.bf16.msra.mxu1 %v906_v19  ;;  %825 = vmatprep.subr.bf16.mxu0 %v907_v20 }
  0x20   : > { %847 = vmatprep.subr.bf16.mxu1 %v908_v21 }
  0x22   : > { %826 = vmatpush3.bf16.msra.mxu0 %v909_v22 }
  0x23   : > { %848 = vmatpush3.bf16.msra.mxu1 %v910_v23  ;;  %827 = vmatprep.subr.bf16.mxu0 %v911_v24 }
  0x24   : > { %849 = vmatprep.subr.bf16.mxu1 %v912_v25 }
  0x26   : > { %828 = vmatpush3.bf16.msra.mxu0 %v913_v26 }
  0x27   : > { %850 = vmatpush3.bf16.msra.mxu1 %v914_v27  ;;  %829 = vmatprep.subr.bf16.mxu0 %v915_v28 }
  0x28   : > { %851 = vmatprep.subr.bf16.mxu1 %v916_v29 }
  0x2a   : > { %830 = vmatpush3.bf16.msra.mxu0 %v917_v30 }
  0x2b   : > { %852 = vmatpush3.bf16.msra.mxu1 %v918_v31  ;;  %864 = vmatprep.subr.bf16.mxu0 %v938_v34 }
  0x2d   : > { %545 = vmatmul.mubr.bf16.vlgmr.msra.gmra.mxu0 %v919_v32 }
  0x2e   : > { %586 = vmatmul.mubr.bf16.vlgmr.msra.gmra.mxu1 %v922_v35  ;;  %865 = vmatpush3.bf16.msra.mxu0 %v925_v37 }
  0x2f   : > { %866 = vmatprep.subr.bf16.mxu0 %v938_v34  ;;  %872 = vmatprep.mubr.msk.bf16.mxu0 %vm939_vm0, %v938_v34 }
  0x32   : > { %867 = vmatpush3.bf16.msra.mxu0 %v926_v38 }
  0x33   : > { %868 = vmatprep.subr.bf16.mxu0 %v938_v34 }
  0x36   : > { %869 = vmatpush3.bf16.msra.mxu0 %v927_v39 }
  0x37   : > { %870 = vmatprep.subr.bf16.mxu0 %v938_v34 }
  0x3a   : > { %871 = vmatpush3.bf16.msra.mxu0 %v928_v40 }
  0x3d   : > { %873 = vmatmul.mubr.msk.bf16.vlgmr.msra.gmra.mxu0 %vm508_vm1, %v929_v41 }
  0xed   : > { %v831_v42 = vpop.f32.mrf.mxu0 }
  0xee   : > { %v853_v43 = vpop.f32.mrf.mxu1 }
  0xef   : > { %v832_v44 = vpop.f32.mrf.mxu0 }
  0xf0   : > { %v854_v45 = vpop.f32.mrf.mxu1  ;;  %v833_v48 = vadd.f32 %v832_v44, %v831_v42 }
  0xf1   : > { %v834_v46 = vpop.f32.mrf.mxu0  ;;  %v855_v49 = vadd.f32 %v854_v45, %v853_v43 }
  0xf2   : > { %v856_v47 = vpop.f32.mrf.mxu1 }
  0xf3   : > { %v835_v50 = vpop.f32.mrf.mxu0  ;;  %v588_v54 = vadd.f32 %v855_v49, %v833_v48 }
  0xf4   : > { %v857_v51 = vpop.f32.mrf.mxu1  ;;  %v836_v52 = vadd.f32 %v835_v50, %v834_v46 }
  0xf5   : > { %v858_v53 = vadd.f32 %v857_v51, %v856_v47 }
  0xf7   : > { %v591_v59 = vadd.f32 %v858_v53, %v836_v52 }
  0xfd   : > { %v628_v55 = vpop.f32.mrf.mxu0 }
  0xfe   : > { %v629_v56 = vadd.f32 %v628_v55, %v588_v54 }
  0xff   : > { %v874_v57 = vpop.f32.mrf.mxu0 }
 0x100   : > { %v813_v58 = vpack.c.bf16 %v629_v56, %v629_v56  ;;  %v655_v61 = vmul.f32 %v629_v56, %v629_v56  ;;  %v646_v0 = vsel %vm508_vm1, %v629_v56, 0.0 }
 0x101   : > { %v631_v60 = vpop.f32.mrf.mxu0 }
 0x102   : > { %644 = vst.msk [vmem:[%s182_s21] sm:$0xf] %vm643_vm2, %v813_v58  ;;  %v632_v62 = vadd.f32 %v631_v60, %v591_v59  ;;  %v657_v5 = vsel %vm508_vm1, %v655_v61, 0.0 }
 0x103   : > { %v875_v63 = vpop.f32.mrf.mxu0 }
 0x104   : > { %v814_v1 = vpack.c.bf16 %v632_v62, %v632_v62  ;;  %v647_v2 = vsel %vm508_vm1, %v632_v62, 0.0  ;;  %v656_v3 = vmul.f32 %v632_v62, %v632_v62 }
 0x105   : > { %v648_v4 = vadd.f32 %v647_v2, %v646_v0 }
 0x106   : > { %645 = vst.msk [vmem:[%s182_s21 + $0x4] sm:$0xf] %vm643_vm2, %v814_v1  ;;  %v658_v6 = vsel %vm508_vm1, %v656_v3, 0.0 }
 0x107   : > { %v649_v7 = vrot.slane %v648_v4, 4  ;;  %v659_v8 = vadd.f32 %v658_v6, %v657_v5 }
 0x109   : > { %v650_v9 = vadd.f32 %v649_v7, %v648_v4  ;;  %v660_v10 = vrot.slane %v659_v8, 4 }
 0x10b   : > { %v651_v11 = vrot.slane %v650_v9, 2  ;;  %v661_v12 = vadd.f32 %v660_v10, %v659_v8 }
 0x10d   : > { %v652_v13 = vadd.f32 %v651_v11, %v650_v9  ;;  %v662_v14 = vrot.slane %v661_v12, 2 }
 0x10f   : > { %v653_v15 = vrot.slane %v652_v13, 1  ;;  %v663_v16 = vadd.f32 %v662_v14, %v661_v12 }
 0x111   : > { %v664_v17 = vrot.slane %v663_v16, 1  ;;  %v654_v18 = vadd.f32 %v653_v15, %v652_v13 }
 0x113   : > { %v665_v19 = vadd.f32 %v664_v17, %v663_v16 }
 0x115   : > { %v667_v20 = vsel %vm666_vm3, %v654_v18, %v665_v19 }
 0x116   : > { %669 = vst.msk [vmem:[%s187_s24] sm:$0x3] %vm668_vm4, %v667_v20 }
 0x117 PF: > { %s14_s12 = sadd.s32 1, %s936_s12  }
 0x118   : > { %p11_p5 = scmp.ge.s32.totalorder %s14_s12, 8  }
 0x11a   :  { %13 = sbr.rel (!%p11_p5) target bundleno = 1 (0x1), region = 70 }

// kernel: cnn_encoder_forward.13
= control target key start
LH: loop header
LB: loop body
LE: loop exit
PB: predicated region body
PF: predicated region fallthrough
CT: control target
= control target key end

     0   :  { %vm46_vm0 = vcmask 519168   ;;  %s98_s0 = inlined_call_operand.vmem [shape: bf16[16,64], index: 0, kind: input, shape index: {}]   ;;  %s99_s1 = inlined_call_operand.vmem [shape: f32[1,64], index: 1, kind: input, shape index: {}]   ;;  %s100_s2 = inlined_call_operand.vmem [shape: f32[1,64], index: 2, kind: input, shape index: {}]   ;;  %s101_s3 = inlined_call_operand.vmem [shape: bf16[16,64], index: 3, kind: output, shape index: {}]  }
   0x1   :  { %v60_v0 = vld [vmem:[%s98_s0] sm:$0xff]  }
   0x2   :  { %v53_v1 = vld [vmem:[%s99_s1] ss:$0 sm:$0xff]  ;;  %v61_v2 = vunpack.c.l.bf16 %v60_v0  ;;  %v62_v3 = vunpack.c.h.bf16 %v60_v0 }
   0x3   :  { %v54_v4 = vld [vmem:[%s100_s2] ss:$0 sm:$0xff] }
   0x4   :  { %v25_v5 = vmul.f32 %v61_v2, %v53_v1  ;;  %v26_v6 = vmul.f32 %v62_v3, %v53_v1 }
   0x6   :  { %v34_v7 = vadd.f32 %v54_v4, %v25_v5  ;;  %v35_v8 = vadd.f32 %v54_v4, %v26_v6 }
   0x8   :  { %v36_v9 = vmax.f32 %v34_v7, 0.0  ;;  %v37_v10 = vmax.f32 %v35_v8, 0.0 }
   0xa   :  { %v57_v11 = vpack.c.bf16 %v36_v9, %v36_v9  ;;  %v58_v12 = vpack.c.bf16 %v37_v10, %v37_v10 }
   0xc   :  { %47 = vst.msk [vmem:[%s101_s3] sm:$0xf] %vm46_vm0, %v57_v11  ;;  %48 = vst.msk [vmem:[%s101_s3 + $0x4] sm:$0xf] %vm46_vm0, %v58_v12 }

// kernel: cnn_encoder_forward.12
= control target key start
LH: loop header
LB: loop body
LE: loop exit
PB: predicated region body
PF: predicated region fallthrough
CT: control target
= control target key end

     0   :  { %v655_v34 = vmov 0.0   ;;  %vm656_vm0 = vmmov 0   ;;  %vm333_vm1 = vcmask 523264   ;;  %vm468_vm2 = vcmask 519168   ;;  %s814_s1 = inlined_call_operand.vmem [shape: bf16[576,64], index: 1, kind: input, shape index: {}]   ;;  %s815_s0 = inlined_call_operand.vmem [shape: bf16[16,576], index: 0, kind: input, shape index: {}]   ;;  %s816_s2 = inlined_call_operand.vmem [shape: bf16[16,64], index: 2, kind: output, shape index: {0}]   ;;  %s817_s3 = inlined_call_operand.vmem [shape: f32[1,2,64], index: 3, kind: output, shape index: {1}]  }
   0x1   :  { %v612_v0 = vld [vmem:[%s814_s1 + $0x78] sm:$0xff]   ;;  %v616_v4 = vld [vmem:[%s814_s1 + $0x70] sm:$0xff]   ;;  %v620_v8 = vld [vmem:[%s814_s1 + $0x68] sm:$0xff]   ;;  %vm491_vm3 = vcmask 1040384   ;;  %vm493_vm4 = vcmask 517120  }
   0x2   :  { %v613_v1 = vld [vmem:[%s814_s1 + $0xf8] sm:$0xff]   ;;  %549 = vmatprep.subr.bf16.mxu0 %v612_v0  ;;  %v617_v5 = vld [vmem:[%s814_s1 + $0xf0] sm:$0xff]   ;;  %v621_v9 = vld [vmem:[%s814_s1 + $0xe8] sm:$0xff]  }
   0x3   :  { %v614_v2 = vld [vmem:[%s814_s1 + $0x38] sm:$0xff]   ;;  %571 = vmatprep.subr.bf16.mxu1 %v613_v1  ;;  %v618_v6 = vld [vmem:[%s814_s1 + $0x30] sm:$0xff]   ;;  %v622_v10 = vld [vmem:[%s814_s1 + $0x28] sm:$0xff]  }
   0x4   :  { %v615_v3 = vld [vmem:[%s814_s1 + $0xb8] sm:$0xff]   ;;  %550 = vmatpush3.bf16.msra.mxu0 %v614_v2  ;;  %v619_v7 = vld [vmem:[%s814_s1 + $0xb0] sm:$0xff]   ;;  %v623_v11 = vld [vmem:[%s814_s1 + $0xa8] sm:$0xff]  }
   0x5   :  { %572 = vmatpush3.bf16.msra.mxu1 %v615_v3  ;;  %551 = vmatprep.subr.bf16.mxu0 %v616_v4  ;;  %v624_v12 = vld [vmem:[%s814_s1 + $0x60] sm:$0xff]   ;;  %v628_v16 = vld [vmem:[%s814_s1 + $0x58] sm:$0xff]   ;;  %v632_v20 = vld [vmem:[%s814_s1 + $0x50] sm:$0xff]  }
   0x6   :  { %573 = vmatprep.subr.bf16.mxu1 %v617_v5  ;;  %v625_v13 = vld [vmem:[%s814_s1 + $0xe0] sm:$0xff]   ;;  %v629_v17 = vld [vmem:[%s814_s1 + $0xd8] sm:$0xff]   ;;  %v633_v21 = vld [vmem:[%s814_s1 + $0xd0] sm:$0xff]  }
   0x7   :  { %v626_v14 = vld [vmem:[%s814_s1 + $0x20] sm:$0xff]   ;;  %v630_v18 = vld [vmem:[%s814_s1 + $0x18] sm:$0xff]   ;;  %v634_v22 = vld [vmem:[%s814_s1 + $0x10] sm:$0xff]  }
   0x8   :  { %552 = vmatpush3.bf16.msra.mxu0 %v618_v6  ;;  %v627_v15 = vld [vmem:[%s814_s1 + $0xa0] sm:$0xff]   ;;  %v631_v19 = vld [vmem:[%s814_s1 + $0x98] sm:$0xff]   ;;  %v635_v23 = vld [vmem:[%s814_s1 + $0x90] sm:$0xff]  }
   0x9   :  { %574 = vmatpush3.bf16.msra.mxu1 %v619_v7  ;;  %553 = vmatprep.subr.bf16.mxu0 %v620_v8  ;;  %v636_v24 = vld [vmem:[%s814_s1 + $0x48] sm:$0xff]   ;;  %v640_v28 = vld [vmem:[%s814_s1 + $0x40] sm:$0xff]   ;;  %v650_v37 = vld [vmem:[%s814_s1 + $0x118] sm:$0xff]  }
   0xa   :  { %575 = vmatprep.subr.bf16.mxu1 %v621_v9  ;;  %v637_v25 = vld [vmem:[%s814_s1 + $0xc8] sm:$0xff]   ;;  %v641_v29 = vld [vmem:[%s814_s1 + $0xc0] sm:$0xff]   ;;  %v651_v38 = vld [vmem:[%s814_s1 + $0x110] sm:$0xff]  }
   0xb   :  { %v638_v26 = vld [vmem:[%s814_s1 + $0x8] sm:$0xff]   ;;  %v642_v30 = vld [vmem:[%s814_s1] sm:$0xff]  }
   0xc   :  { %554 = vmatpush3.bf16.msra.mxu0 %v622_v10  ;;  %v639_v27 = vld [vmem:[%s814_s1 + $0x88] sm:$0xff]   ;;  %v643_v31 = vld [vmem:[%s814_s1 + $0x80] sm:$0xff]  }
   0xd   :  { %576 = vmatpush3.bf16.msra.mxu1 %v623_v11  ;;  %555 = vmatprep.subr.bf16.mxu0 %v624_v12  ;;  %v644_v32 = vld [vmem:[%s815_s0] ss:$20 sps:$4 sm:$0xff]   ;;  %v646_v33 = vld [vmem:[%s815_s0 + $0x4] ss:$20 sps:$4 sm:$0xff]   ;;  %v647_v35 = vld [vmem:[%s815_s0 + $0x8] ss:$20 sps:$4 sm:$0xff]  }
   0xe   :  { %577 = vmatprep.subr.bf16.mxu1 %v625_v13  ;;  %v649_v36 = vld [vmem:[%s815_s0 + $0xc] ss:$20 sps:$4 sm:$0xff]   ;;  %369 = vmatprep.mubr.bf16.mxu0 %v646_v33  ;;  %v654_v41 = vld [vmem:[%s815_s0 + $0x10] ss:$20 sps:$4 sm:$0xff]  }
   0xf   :  { %410 = vmatprep.mubr.bf16.mxu1 %v649_v36  ;;  %v652_v39 = vld [vmem:[%s814_s1 + $0x108] sm:$0xff]   ;;  %v653_v40 = vld [vmem:[%s814_s1 + $0x100] sm:$0xff]  }
  0x10   :  { %556 = vmatpush3.bf16.msra.mxu0 %v626_v14 }
  0x11   :  { %578 = vmatpush3.bf16.msra.mxu1 %v627_v15  ;;  %557 = vmatprep.subr.bf16.mxu0 %v628_v16 }
  0x12   :  { %579 = vmatprep.subr.bf16.mxu1 %v629_v17 }
  0x14   :  { %558 = vmatpush3.bf16.msra.mxu0 %v630_v18 }
  0x15   :  { %580 = vmatpush3.bf16.msra.mxu1 %v631_v19  ;;  %559 = vmatprep.subr.bf16.mxu0 %v632_v20 }
  0x16   :  { %581 = vmatprep.subr.bf16.mxu1 %v633_v21 }
  0x18   :  { %560 = vmatpush3.bf16.msra.mxu0 %v634_v22 }
  0x19   :  { %582 = vmatpush3.bf16.msra.mxu1 %v635_v23  ;;  %561 = vmatprep.subr.bf16.mxu0 %v636_v24 }
  0x1a   :  { %583 = vmatprep.subr.bf16.mxu1 %v637_v25 }
  0x1c   :  { %562 = vmatpush3.bf16.msra.mxu0 %v638_v26 }
  0x1d   :  { %584 = vmatpush3.bf16.msra.mxu1 %v639_v27  ;;  %563 = vmatprep.subr.bf16.mxu0 %v640_v28 }
  0x1e   :  { %585 = vmatprep.subr.bf16.mxu1 %v641_v29 }
  0x20   :  { %564 = vmatpush3.bf16.msra.mxu0 %v642_v30 }
  0x21   :  { %586 = vmatpush3.bf16.msra.mxu1 %v643_v31  ;;  %598 = vmatprep.subr.bf16.mxu0 %v655_v34 }
  0x23   :  { %370 = vmatmul.mubr.bf16.vlgmr.msra.gmra.mxu0 %v644_v32 }
  0x24   :  { %411 = vmatmul.mubr.bf16.vlgmr.msra.gmra.mxu1 %v647_v35  ;;  %599 = vmatpush3.bf16.msra.mxu0 %v650_v37 }
  0x25   :  { %600 = vmatprep.subr.bf16.mxu0 %v655_v34  ;;  %606 = vmatprep.mubr.msk.bf16.mxu0 %vm656_vm0, %v655_v34 }
  0x28   :  { %601 = vmatpush3.bf16.msra.mxu0 %v651_v38 }
  0x29   :  { %602 = vmatprep.subr.bf16.mxu0 %v655_v34 }
  0x2c   :  { %603 = vmatpush3.bf16.msra.mxu0 %v652_v39 }
  0x2d   :  { %604 = vmatprep.subr.bf16.mxu0 %v655_v34 }
  0x30   :  { %605 = vmatpush3.bf16.msra.mxu0 %v653_v40 }
  0x33   :  { %607 = vmatmul.mubr.msk.bf16.vlgmr.msra.gmra.mxu0 %vm333_vm1, %v654_v41 }
  0xe3   :  { %v565_v42 = vpop.f32.mrf.mxu0 }
  0xe4   :  { %v587_v43 = vpop.f32.mrf.mxu1 }
  0xe5   :  { %v566_v44 = vpop.f32.mrf.mxu0 }
  0xe6   :  { %v588_v45 = vpop.f32.mrf.mxu1  ;;  %v567_v48 = vadd.f32 %v566_v44, %v565_v42 }
  0xe7   :  { %v568_v46 = vpop.f32.mrf.mxu0  ;;  %v589_v49 = vadd.f32 %v588_v45, %v587_v43 }
  0xe8   :  { %v590_v47 = vpop.f32.mrf.mxu1 }
  0xe9   :  { %v569_v50 = vpop.f32.mrf.mxu0  ;;  %v413_v54 = vadd.f32 %v589_v49, %v567_v48 }
  0xea   :  { %v591_v51 = vpop.f32.mrf.mxu1  ;;  %v570_v52 = vadd.f32 %v569_v50, %v568_v46 }
  0xeb   :  { %v592_v53 = vadd.f32 %v591_v51, %v590_v47 }
  0xed   :  { %v416_v59 = vadd.f32 %v592_v53, %v570_v52 }
  0xf3   :  { %v453_v55 = vpop.f32.mrf.mxu0 }
  0xf4   :  { %v454_v56 = vadd.f32 %v453_v55, %v413_v54 }
  0xf5   :  { %v608_v57 = vpop.f32.mrf.mxu0 }
  0xf6   :  { %v547_v58 = vpack.c.bf16 %v454_v56, %v454_v56  ;;  %v480_v61 = vmul.f32 %v454_v56, %v454_v56  ;;  %v471_v0 = vsel %vm333_vm1, %v454_v56, 0.0 }
  0xf7   :  { %v456_v60 = vpop.f32.mrf.mxu0 }
  0xf8   :  { %469 = vst.msk [vmem:[%s816_s2] sm:$0xf] %vm468_vm2, %v547_v58  ;;  %v457_v62 = vadd.f32 %v456_v60, %v416_v59  ;;  %v482_v5 = vsel %vm333_vm1, %v480_v61, 0.0 }
  0xf9   :  { %v609_v63 = vpop.f32.mrf.mxu0 }
  0xfa   :  { %v548_v1 = vpack.c.bf16 %v457_v62, %v457_v62  ;;  %v472_v2 = vsel %vm333_vm1, %v457_v62, 0.0  ;;  %v481_v3 = vmul.f32 %v457_v62, %v457_v62 }
  0xfb   :  { %v473_v4 = vadd.f32 %v472_v2, %v471_v0 }
  0xfc   :  { %470 = vst.msk [vmem:[%s816_s2 + $0x4] sm:$0xf] %vm468_vm2, %v548_v1  ;;  %v483_v6 = vsel %vm333_vm1, %v481_v3, 0.0 }
  0xfd   :  { %v474_v7 = vrot.slane %v473_v4, 4  ;;  %v484_v8 = vadd.f32 %v483_v6, %v482_v5 }
  0xff   :  { %v475_v9 = vadd.f32 %v474_v7, %v473_v4  ;;  %v485_v10 = vrot.slane %v484_v8, 4 }
 0x101   :  { %v476_v11 = vrot.slane %v475_v9, 2  ;;  %v486_v12 = vadd.f32 %v485_v10, %v484_v8 }
 0x103   :  { %v477_v13 = vadd.f32 %v476_v11, %v475_v9  ;;  %v487_v14 = vrot.slane %v486_v12, 2 }
 0x105   :  { %v478_v15 = vrot.slane %v477_v13, 1  ;;  %v488_v16 = vadd.f32 %v487_v14, %v486_v12 }
 0x107   :  { %v489_v17 = vrot.slane %v488_v16, 1  ;;  %v479_v18 = vadd.f32 %v478_v15, %v477_v13 }
 0x109   :  { %v490_v19 = vadd.f32 %v489_v17, %v488_v16 }
 0x10b   :  { %v492_v20 = vsel %vm491_vm3, %v479_v18, %v490_v19 }
 0x10c   :  { %494 = vst.msk [vmem:[%s817_s3] sm:$0x3] %vm493_vm4, %v492_v20 }

// kernel: cnn_encoder_forward.15
= control target key start
LH: loop header
LB: loop body
LE: loop exit
PB: predicated region body
PF: predicated region fallthrough
CT: control target
= control target key end

     0   :  { %vm38_vm0 = vcmask 523264   ;;  %s86_s0 = inlined_call_operand.vmem [shape: bf16[16,64], index: 0, kind: input, shape index: {}]   ;;  %s87_s1 = inlined_call_operand.vmem [shape: f32[1,64], index: 1, kind: input, shape index: {}]   ;;  %s88_s2 = inlined_call_operand.vmem [shape: f32[1,64], index: 2, kind: input, shape index: {}]   ;;  %s89_s3 = inlined_call_operand.vmem [shape: f32[16,64], index: 3, kind: output, shape index: {}]  }
   0x1   :  { %v48_v0 = vld [vmem:[%s86_s0] sm:$0xff]  }
   0x2   :  { %v45_v1 = vld [vmem:[%s87_s1] ss:$0 sm:$0xff]  ;;  %v49_v2 = vunpack.c.l.bf16 %v48_v0  ;;  %v50_v3 = vunpack.c.h.bf16 %v48_v0 }
   0x3   :  { %v46_v4 = vld [vmem:[%s88_s2] ss:$0 sm:$0xff] }
   0x4   :  { %v25_v5 = vmul.f32 %v49_v2, %v45_v1  ;;  %v26_v6 = vmul.f32 %v50_v3, %v45_v1 }
   0x6   :  { %v34_v7 = vadd.f32 %v46_v4, %v25_v5  ;;  %v35_v8 = vadd.f32 %v46_v4, %v26_v6 }
   0x8   :  { %v36_v9 = vmax.f32 %v34_v7, 0.0  ;;  %v37_v10 = vmax.f32 %v35_v8, 0.0 }
   0xa   :  { %39 = vst.msk [vmem:[%s89_s3] sm:$0xff] %vm38_vm0, %v36_v9  ;;  %40 = vst.msk [vmem:[%s89_s3 + $0x8] sm:$0xff] %vm38_vm0, %v37_v10 }

</bundles_post_ra>
